<compile_context>
chip_gen: v7x
topology: tpu7x:2x2x1
jax: 0.10.0
libtpu: 0.0.40
codegen_flags: <defaults>
</compile_context>

<pallas_src>
import jax
import jax.numpy as jnp
from jax.experimental import pallas as pl
from jax.experimental.pallas import tpu as pltpu

BN_EPS = 1e-5
LANE = 128


def gcn_kernel(a_ref, p_ref, x_ref,
               w1r_ref, w1s_ref, b1_ref, g1_ref, be1_ref,
               w2r_ref, w2s_ref, b2_ref, g2_ref, be2_ref,
               w3_ref, b3_ref, o_ref):
    x = x_ref[...]                                  # [N, Fp]
    a = a_ref[...]                                  # [N, N]

    # ---- conv1: GraphConv = (A @ x) @ W1_rel + x @ W1_root + b1 ----
    ax = jnp.dot(a, x, preferred_element_type=jnp.float32)
    h = (jnp.dot(ax, w1r_ref[...], preferred_element_type=jnp.float32)
         + jnp.dot(x, w1s_ref[...], preferred_element_type=jnp.float32)
         + b1_ref[...])
    h = jnp.maximum(h, 0.0)                         # ReLU

    # ---- bn1: training-mode batch stats over the N nodes ----
    n = h.shape[0]
    mean1 = jnp.sum(h, axis=0, keepdims=True) / n
    diff1 = h - mean1
    var1 = jnp.sum(diff1 * diff1, axis=0, keepdims=True) / n      # biased variance
    s1 = g1_ref[...] * jax.lax.rsqrt(var1 + BN_EPS)               # [1, Hp]
    t1 = be1_ref[...] - mean1 * s1                                # [1, Hp]
    hn = h * s1 + t1        # explicit: conv2 re-aggregates these node features

    # ---- conv2 (reference forward has no ReLU here) ----
    ah = jnp.dot(a, hn, preferred_element_type=jnp.float32)
    h2 = (jnp.dot(ah, w2r_ref[...], preferred_element_type=jnp.float32)
          + jnp.dot(hn, w2s_ref[...], preferred_element_type=jnp.float32)
          + b2_ref[...])

    # ---- bn2 stats (normalization folded through the mean-pool below) ----
    mean2 = jnp.sum(h2, axis=0, keepdims=True) / n
    diff2 = h2 - mean2
    var2 = jnp.sum(diff2 * diff2, axis=0, keepdims=True) / n
    s2 = g2_ref[...] * jax.lax.rsqrt(var2 + BN_EPS)
    t2 = be2_ref[...] - mean2 * s2

    # ---- global_mean_pool (row-stochastic P) + folded bn2 + final Linear ----
    pooled = jnp.dot(p_ref[...], h2, preferred_element_type=jnp.float32)   # [G, Hp]
    pooled = pooled * s2 + t2            # == P @ bn2(h2), since P rows sum to 1
    out = jnp.dot(pooled, w3_ref[...], preferred_element_type=jnp.float32) + b3_ref[...]
    o_ref[...] = out.astype(o_ref.dtype)


def _pad_to(a, axis, size):
    pad = size - a.shape[axis]
    if pad <= 0:
        return a
    widths = [(0, 0)] * a.ndim
    widths[axis] = (0, pad)
    return jnp.pad(a, widths)


def _round_up(v, m):
    return ((v + m - 1) // m) * m


def gcn_forward(x, edge_index, batch, params, num_graphs):
    """x: [N, F] f32, edge_index: [2, E] int32 (row0 = src j, row1 = dst i),
    batch: [N] int32 graph ids in [0, num_graphs).  Returns [num_graphs, C] f32."""
    (w1r, w1s, b1, g1, be1, w2r, w2s, b2, g2, be2, w3, b3) = params
    N, F = x.shape
    H = w1r.shape[1]
    C = w3.shape[1]
    G = num_graphs
    assert N % 8 == 0, "node count must be a multiple of 8 (BN batch dim is not padded)"

    # dense adjacency for sum aggregation: A[i, j] = #edges (j -> i)
    src, dst = edge_index[0], edge_index[1]
    A = jnp.zeros((N, N), jnp.float32).at[dst, src].add(1.0)
    # row-stochastic mean-pool matrix: P[g, i] = 1/|V_g| if batch[i] == g
    onehot = jax.nn.one_hot(batch, G, dtype=jnp.float32)           # [N, G]
    counts = jnp.maximum(onehot.sum(axis=0), 1.0)                  # [G]
    P = (onehot / counts[None, :]).T                               # [G, N]

    # lane-dense zero padding of feature dims to multiples of 128
    Fp, Hp, Cp = _round_up(F, LANE), _round_up(H, LANE), _round_up(C, LANE)
    xp = _pad_to(x, 1, Fp)
    w1r_p = _pad_to(_pad_to(w1r, 0, Fp), 1, Hp)
    w1s_p = _pad_to(_pad_to(w1s, 0, Fp), 1, Hp)
    b1_p, g1_p, be1_p = (_pad_to(v, 1, Hp) for v in (b1, g1, be1))
    w2r_p = _pad_to(_pad_to(w2r, 0, Hp), 1, Hp)
    w2s_p = _pad_to(_pad_to(w2s, 0, Hp), 1, Hp)
    b2_p, g2_p, be2_p = (_pad_to(v, 1, Hp) for v in (b2, g2, be2))
    w3_p = _pad_to(_pad_to(w3, 0, Hp), 1, Cp)
    b3_p = _pad_to(b3, 1, Cp)

    full = lambda shape: pl.BlockSpec(shape, lambda: tuple(0 for _ in shape))

    flops = 2 * (N * N * Fp            # A @ x
                 + 2 * N * Fp * Hp     # conv1 rel + root
                 + N * N * Hp          # A @ hn
                 + 2 * N * Hp * Hp     # conv2 rel + root
                 + G * N * Hp          # mean pool
                 + G * Hp * Cp)        # final linear
    bytes_accessed = 4 * (N * N + G * N + N * Fp + 2 * Fp * Hp + 2 * Hp * Hp
                          + Hp * Cp + 8 * Hp + 2 * Cp + G * Cp)

    out_p = pl.pallas_call(
        gcn_kernel,
        out_shape=jax.ShapeDtypeStruct((G, Cp), jnp.float32),
        grid=(),  # everything resident: launch/DMA overhead dominates at these sizes
        in_specs=[
            full((N, N)),                       # A
            full((G, N)),                       # P
            full((N, Fp)),                      # x
            full((Fp, Hp)), full((Fp, Hp)),     # conv1 W_rel, W_root
            full((1, Hp)), full((1, Hp)), full((1, Hp)),   # b1, gamma1, beta1
            full((Hp, Hp)), full((Hp, Hp)),     # conv2 W_rel, W_root
            full((1, Hp)), full((1, Hp)), full((1, Hp)),   # b2, gamma2, beta2
            full((Hp, Cp)), full((1, Cp)),      # final Linear W, b
        ],
        out_specs=full((G, Cp)),
        compiler_params=pltpu.CompilerParams(vmem_limit_bytes=64 * 1024 * 1024),
        cost_estimate=pl.CostEstimate(flops=int(flops),
                                      transcendentals=int(2 * Hp),
                                      bytes_accessed=int(bytes_accessed)),
    )(A, P, xp, w1r_p, w1s_p, b1_p, g1_p, be1_p,
      w2r_p, w2s_p, b2_p, g2_p, be2_p, w3_p, b3_p)

    return out_p[:, :C]


def init_params(key, number_of_features, number_of_classes, hidden_channels):
    """Deterministic PyTorch-Linear-style init (uniform +/- 1/sqrt(fan_in)).
    GraphConv = lin_rel (with bias) + lin_root (no bias); weights stored [in, out]."""
    F, H, C = number_of_features, hidden_channels, number_of_classes
    ks = jax.random.split(key, 8)
    u = lambda k, shape, b: jax.random.uniform(k, shape, jnp.float32, -b, b)
    bF = 1.0 / (F ** 0.5)
    bH = 1.0 / (H ** 0.5)
    w1r = u(ks[0], (F, H), bF)
    w1s = u(ks[1], (F, H), bF)
    b1 = u(ks[2], (1, H), bF)
    w2r = u(ks[3], (H, H), bH)
    w2s = u(ks[4], (H, H), bH)
    b2 = u(ks[5], (1, H), bH)
    w3 = u(ks[6], (H, C), bH)
    b3 = u(ks[7], (1, C), bH)
    g1 = jnp.ones((1, H), jnp.float32)
    be1 = jnp.zeros((1, H), jnp.float32)
    g2 = jnp.ones((1, H), jnp.float32)
    be2 = jnp.zeros((1, H), jnp.float32)
    return (w1r, w1s, b1, g1, be1, w2r, w2s, b2, g2, be2, w3, b3)


if __name__ == "__main__":
    number_of_features = 16
    number_of_classes = 8
    hidden_channels = 32
    num_nodes = 128          # multiple of 8; also makes A [128,128] lane-dense
    num_graphs = 4
    num_edges = 512

    key = jax.random.PRNGKey(0)
    kx, ke, kp = jax.random.split(key, 3)
    x = jax.random.normal(kx, (num_nodes, number_of_features), jnp.float32)
    edge_index = jax.random.randint(ke, (2, num_edges), 0, num_nodes, dtype=jnp.int32)
    batch = jnp.repeat(jnp.arange(num_graphs, dtype=jnp.int32),
                       num_nodes // num_graphs)

    params = init_params(kp, number_of_features, number_of_classes, hidden_channels)

    out = gcn_forward(x, edge_index, batch, params, num_graphs)
    jax.block_until_ready(out)

    # ---------- pure-JAX reference of the same (unfolded, unpadded) math ----------
    (w1r, w1s, b1, g1, be1, w2r, w2s, b2, g2, be2, w3, b3) = params
    N = num_nodes
    src, dst = edge_index[0], edge_index[1]
    A = jnp.zeros((N, N), jnp.float32).at[dst, src].add(1.0)
    onehot = jax.nn.one_hot(batch, num_graphs, dtype=jnp.float32)
    counts = jnp.maximum(onehot.sum(axis=0), 1.0)
    P = (onehot / counts[None, :]).T
    eps = BN_EPS

    h = jnp.maximum((A @ x) @ w1r + x @ w1s + b1, 0.0)
    m1 = h.mean(0, keepdims=True)
    v1 = ((h - m1) ** 2).mean(0, keepdims=True)
    hn = (h - m1) / jnp.sqrt(v1 + eps) * g1 + be1
    h2 = (A @ hn) @ w2r + hn @ w2s + b2
    m2 = h2.mean(0, keepdims=True)
    v2 = ((h2 - m2) ** 2).mean(0, keepdims=True)
    h2n = (h2 - m2) / jnp.sqrt(v2 + eps) * g2 + be2
    ref = (P @ h2n) @ w3 + b3

    assert out.shape == (num_graphs, number_of_classes)
    assert jnp.allclose(out, ref, atol=5e-4, rtol=5e-4), "mismatch vs reference"

    print("KERNEL_OK")
</pallas_src>

<mosaic_0001>
module attributes {stable_mosaic.version = 11 : i64} {
  func.func @gcn_kernel(%arg0: memref<128x128xf32, #tpu.memory_space<vmem>>, %arg1: memref<4x128xf32, #tpu.memory_space<vmem>>, %arg2: memref<128x128xf32, #tpu.memory_space<vmem>>, %arg3: memref<128x128xf32, #tpu.memory_space<vmem>>, %arg4: memref<128x128xf32, #tpu.memory_space<vmem>>, %arg5: memref<1x128xf32, #tpu.memory_space<vmem>>, %arg6: memref<1x128xf32, #tpu.memory_space<vmem>>, %arg7: memref<1x128xf32, #tpu.memory_space<vmem>>, %arg8: memref<128x128xf32, #tpu.memory_space<vmem>>, %arg9: memref<128x128xf32, #tpu.memory_space<vmem>>, %arg10: memref<1x128xf32, #tpu.memory_space<vmem>>, %arg11: memref<1x128xf32, #tpu.memory_space<vmem>>, %arg12: memref<1x128xf32, #tpu.memory_space<vmem>>, %arg13: memref<128x128xf32, #tpu.memory_space<vmem>>, %arg14: memref<1x128xf32, #tpu.memory_space<vmem>>, %arg15: memref<4x128xf32, #tpu.memory_space<vmem>>) attributes {dimension_semantics = [], scalar_prefetch = 0 : i64, scratch_operands = 0 : i64, tpu.core_type = #tpu.core_type<tc>} {
    %c0 = arith.constant 0 : index
    %c0_0 = arith.constant 0 : index
    %0 = vector.load %arg2[%c0, %c0_0] : memref<128x128xf32, #tpu.memory_space<vmem>>, vector<128x128xf32>
    %c0_1 = arith.constant 0 : index
    %c0_2 = arith.constant 0 : index
    %1 = vector.load %arg0[%c0_1, %c0_2] : memref<128x128xf32, #tpu.memory_space<vmem>>, vector<128x128xf32>
    %cst = arith.constant dense<0.000000e+00> : vector<128x128xf32>
    %2 = tpu.matmul %1, %0, %cst {dimension_numbers = #tpu.dot_dimension_numbers<[1], [0], [0], [1], [0, 0, 1, 1], [], []>} : vector<128x128xf32>, vector<128x128xf32>, vector<128x128xf32> -> vector<128x128xf32>
    %c0_3 = arith.constant 0 : index
    %c0_4 = arith.constant 0 : index
    %3 = vector.load %arg3[%c0_3, %c0_4] : memref<128x128xf32, #tpu.memory_space<vmem>>, vector<128x128xf32>
    %cst_5 = arith.constant dense<0.000000e+00> : vector<128x128xf32>
    %4 = tpu.matmul %2, %3, %cst_5 {dimension_numbers = #tpu.dot_dimension_numbers<[1], [0], [0], [1], [0, 0, 1, 1], [], []>} : vector<128x128xf32>, vector<128x128xf32>, vector<128x128xf32> -> vector<128x128xf32>
    %c0_6 = arith.constant 0 : index
    %c0_7 = arith.constant 0 : index
    %5 = vector.load %arg4[%c0_6, %c0_7] : memref<128x128xf32, #tpu.memory_space<vmem>>, vector<128x128xf32>
    %cst_8 = arith.constant dense<0.000000e+00> : vector<128x128xf32>
    %6 = tpu.matmul %0, %5, %cst_8 {dimension_numbers = #tpu.dot_dimension_numbers<[1], [0], [0], [1], [0, 0, 1, 1], [], []>} : vector<128x128xf32>, vector<128x128xf32>, vector<128x128xf32> -> vector<128x128xf32>
    %7 = arith.addf %4, %6 : vector<128x128xf32>
    %c0_9 = arith.constant 0 : index
    %c0_10 = arith.constant 0 : index
    %8 = vector.load %arg5[%c0_9, %c0_10] : memref<1x128xf32, #tpu.memory_space<vmem>>, vector<1x128xf32>
    %9 = vector.broadcast %8 : vector<1x128xf32> to vector<128x128xf32>
    %10 = arith.addf %7, %9 : vector<128x128xf32>
    %cst_11 = arith.constant 0.000000e+00 : f32
    %11 = vector.broadcast %cst_11 : f32 to vector<128x128xf32>
    %12 = arith.maximumf %10, %11 : vector<128x128xf32>
    %cst_12 = arith.constant dense<0.000000e+00> : vector<128xf32>
    %13 = vector.multi_reduction <add>, %12, %cst_12 [0] : vector<128x128xf32> to vector<128xf32>
    %14 = vector.shape_cast %13 : vector<128xf32> to vector<1x128xf32>
    %cst_13 = arith.constant 1.280000e+02 : f32
    %15 = vector.broadcast %cst_13 : f32 to vector<1x128xf32>
    %16 = arith.divf %14, %15 : vector<1x128xf32>
    %17 = vector.broadcast %16 : vector<1x128xf32> to vector<128x128xf32>
    %18 = arith.subf %12, %17 : vector<128x128xf32>
    %19 = arith.mulf %18, %18 : vector<128x128xf32>
    %cst_14 = arith.constant dense<0.000000e+00> : vector<128xf32>
    %20 = vector.multi_reduction <add>, %19, %cst_14 [0] : vector<128x128xf32> to vector<128xf32>
    %21 = vector.shape_cast %20 : vector<128xf32> to vector<1x128xf32>
    %cst_15 = arith.constant 1.280000e+02 : f32
    %22 = vector.broadcast %cst_15 : f32 to vector<1x128xf32>
    %23 = arith.divf %21, %22 : vector<1x128xf32>
    %c0_16 = arith.constant 0 : index
    %c0_17 = arith.constant 0 : index
    %24 = vector.load %arg6[%c0_16, %c0_17] : memref<1x128xf32, #tpu.memory_space<vmem>>, vector<1x128xf32>
    %cst_18 = arith.constant 9.99999974E-6 : f32
    %25 = vector.broadcast %cst_18 : f32 to vector<1x128xf32>
    %26 = arith.addf %23, %25 : vector<1x128xf32>
    %27 = math.rsqrt %26 : vector<1x128xf32>
    %28 = arith.mulf %24, %27 : vector<1x128xf32>
    %c0_19 = arith.constant 0 : index
    %c0_20 = arith.constant 0 : index
    %29 = vector.load %arg7[%c0_19, %c0_20] : memref<1x128xf32, #tpu.memory_space<vmem>>, vector<1x128xf32>
    %30 = arith.mulf %16, %28 : vector<1x128xf32>
    %31 = arith.subf %29, %30 : vector<1x128xf32>
    %32 = vector.broadcast %28 : vector<1x128xf32> to vector<128x128xf32>
    %33 = arith.mulf %12, %32 : vector<128x128xf32>
    %34 = vector.broadcast %31 : vector<1x128xf32> to vector<128x128xf32>
    %35 = arith.addf %33, %34 : vector<128x128xf32>
    %cst_21 = arith.constant dense<0.000000e+00> : vector<128x128xf32>
    %36 = tpu.matmul %1, %35, %cst_21 {dimension_numbers = #tpu.dot_dimension_numbers<[1], [0], [0], [1], [0, 0, 1, 1], [], []>} : vector<128x128xf32>, vector<128x128xf32>, vector<128x128xf32> -> vector<128x128xf32>
    %c0_22 = arith.constant 0 : index
    %c0_23 = arith.constant 0 : index
    %37 = vector.load %arg8[%c0_22, %c0_23] : memref<128x128xf32, #tpu.memory_space<vmem>>, vector<128x128xf32>
    %cst_24 = arith.constant dense<0.000000e+00> : vector<128x128xf32>
    %38 = tpu.matmul %36, %37, %cst_24 {dimension_numbers = #tpu.dot_dimension_numbers<[1], [0], [0], [1], [0, 0, 1, 1], [], []>} : vector<128x128xf32>, vector<128x128xf32>, vector<128x128xf32> -> vector<128x128xf32>
    %c0_25 = arith.constant 0 : index
    %c0_26 = arith.constant 0 : index
    %39 = vector.load %arg9[%c0_25, %c0_26] : memref<128x128xf32, #tpu.memory_space<vmem>>, vector<128x128xf32>
    %cst_27 = arith.constant dense<0.000000e+00> : vector<128x128xf32>
    %40 = tpu.matmul %35, %39, %cst_27 {dimension_numbers = #tpu.dot_dimension_numbers<[1], [0], [0], [1], [0, 0, 1, 1], [], []>} : vector<128x128xf32>, vector<128x128xf32>, vector<128x128xf32> -> vector<128x128xf32>
    %41 = arith.addf %38, %40 : vector<128x128xf32>
    %c0_28 = arith.constant 0 : index
    %c0_29 = arith.constant 0 : index
    %42 = vector.load %arg10[%c0_28, %c0_29] : memref<1x128xf32, #tpu.memory_space<vmem>>, vector<1x128xf32>
    %43 = vector.broadcast %42 : vector<1x128xf32> to vector<128x128xf32>
    %44 = arith.addf %41, %43 : vector<128x128xf32>
    %cst_30 = arith.constant dense<0.000000e+00> : vector<128xf32>
    %45 = vector.multi_reduction <add>, %44, %cst_30 [0] : vector<128x128xf32> to vector<128xf32>
    %46 = vector.shape_cast %45 : vector<128xf32> to vector<1x128xf32>
    %cst_31 = arith.constant 1.280000e+02 : f32
    %47 = vector.broadcast %cst_31 : f32 to vector<1x128xf32>
    %48 = arith.divf %46, %47 : vector<1x128xf32>
    %49 = vector.broadcast %48 : vector<1x128xf32> to vector<128x128xf32>
    %50 = arith.subf %44, %49 : vector<128x128xf32>
    %51 = arith.mulf %50, %50 : vector<128x128xf32>
    %cst_32 = arith.constant dense<0.000000e+00> : vector<128xf32>
    %52 = vector.multi_reduction <add>, %51, %cst_32 [0] : vector<128x128xf32> to vector<128xf32>
    %53 = vector.shape_cast %52 : vector<128xf32> to vector<1x128xf32>
    %cst_33 = arith.constant 1.280000e+02 : f32
    %54 = vector.broadcast %cst_33 : f32 to vector<1x128xf32>
    %55 = arith.divf %53, %54 : vector<1x128xf32>
    %c0_34 = arith.constant 0 : index
    %c0_35 = arith.constant 0 : index
    %56 = vector.load %arg11[%c0_34, %c0_35] : memref<1x128xf32, #tpu.memory_space<vmem>>, vector<1x128xf32>
    %cst_36 = arith.constant 9.99999974E-6 : f32
    %57 = vector.broadcast %cst_36 : f32 to vector<1x128xf32>
    %58 = arith.addf %55, %57 : vector<1x128xf32>
    %59 = math.rsqrt %58 : vector<1x128xf32>
    %60 = arith.mulf %56, %59 : vector<1x128xf32>
    %c0_37 = arith.constant 0 : index
    %c0_38 = arith.constant 0 : index
    %61 = vector.load %arg12[%c0_37, %c0_38] : memref<1x128xf32, #tpu.memory_space<vmem>>, vector<1x128xf32>
    %62 = arith.mulf %48, %60 : vector<1x128xf32>
    %63 = arith.subf %61, %62 : vector<1x128xf32>
    %c0_39 = arith.constant 0 : index
    %c0_40 = arith.constant 0 : index
    %64 = vector.load %arg1[%c0_39, %c0_40] : memref<4x128xf32, #tpu.memory_space<vmem>>, vector<4x128xf32>
    %cst_41 = arith.constant dense<0.000000e+00> : vector<4x128xf32>
    %65 = tpu.matmul %64, %44, %cst_41 {dimension_numbers = #tpu.dot_dimension_numbers<[1], [0], [0], [1], [0, 0, 1, 1], [], []>} : vector<4x128xf32>, vector<128x128xf32>, vector<4x128xf32> -> vector<4x128xf32>
    %66 = vector.broadcast %60 : vector<1x128xf32> to vector<4x128xf32>
    %67 = arith.mulf %65, %66 : vector<4x128xf32>
    %68 = vector.broadcast %63 : vector<1x128xf32> to vector<4x128xf32>
    %69 = arith.addf %67, %68 : vector<4x128xf32>
    %c0_42 = arith.constant 0 : index
    %c0_43 = arith.constant 0 : index
    %70 = vector.load %arg13[%c0_42, %c0_43] : memref<128x128xf32, #tpu.memory_space<vmem>>, vector<128x128xf32>
    %cst_44 = arith.constant dense<0.000000e+00> : vector<4x128xf32>
    %71 = tpu.matmul %69, %70, %cst_44 {dimension_numbers = #tpu.dot_dimension_numbers<[1], [0], [0], [1], [0, 0, 1, 1], [], []>} : vector<4x128xf32>, vector<128x128xf32>, vector<4x128xf32> -> vector<4x128xf32>
    %c0_45 = arith.constant 0 : index
    %c0_46 = arith.constant 0 : index
    %72 = vector.load %arg14[%c0_45, %c0_46] : memref<1x128xf32, #tpu.memory_space<vmem>>, vector<1x128xf32>
    %73 = vector.broadcast %72 : vector<1x128xf32> to vector<4x128xf32>
    %74 = arith.addf %71, %73 : vector<4x128xf32>
    %c0_47 = arith.constant 0 : index
    %c0_48 = arith.constant 0 : index
    %75 = vector.load %arg15[%c0_47, %c0_48] : memref<4x128xf32, #tpu.memory_space<vmem>>, vector<4x128xf32>
    tpu.vector_store %arg15[%c0_47, %c0_48], %74 {strides = array<i32>} : memref<4x128xf32, #tpu.memory_space<vmem>>, vector<4x128xf32>,
    return
  }
}

</mosaic_0001>

<bundles_post_ra>
// kernel: tpu_custom_call.1
= control target key start
LH: loop header
LB: loop body
LE: loop exit
PB: predicated region body
PF: predicated region fallthrough
CT: control target
= control target key end

     0   :  { %20 = vsyncpa [#allocation3], 0  ;;  %s3714_s0 = inlined_call_operand.hbm [shape: f32[128,128], index: 0, kind: input, shape index: {}]   ;;  %s3715_s1 = inlined_call_operand.hbm [shape: f32[4,128], index: 1, kind: input, shape index: {}]   ;;  %s3716_s2 = inlined_call_operand.hbm [shape: f32[128,128], index: 2, kind: input, shape index: {}]   ;;  %s3717_s3 = inlined_call_operand.hbm [shape: f32[128,128], index: 3, kind: input, shape index: {}]   ;;  %s3718_s4 = inlined_call_operand.hbm [shape: f32[128,128], index: 4, kind: input, shape index: {}]   ;;  %s3719_s5 = inlined_call_operand.hbm [shape: f32[1,128], index: 5, kind: input, shape index: {}]   ;;  %s3720_s6 = inlined_call_operand.hbm [shape: f32[1,128], index: 6, kind: input, shape index: {}]   ;;  %s3721_s7 = inlined_call_operand.hbm [shape: f32[1,128], index: 7, kind: input, shape index: {}]   ;;  %s3722_s8 = inlined_call_operand.hbm [shape: f32[128,128], index: 8, kind: input, shape index: {}]   ;;  %s3723_s9 = inlined_call_operand.hbm [shape: f32[128,128], index: 9, kind: input, shape index: {}]   ;;  %s3724_s10 = inlined_call_operand.hbm [shape: f32[1,128], index: 10, kind: input, shape index: {}]   ;;  %s3725_s11 = inlined_call_operand.hbm [shape: f32[1,128], index: 11, kind: input, shape index: {}]   ;;  %s3726_s12 = inlined_call_operand.hbm [shape: f32[1,128], index: 12, kind: input, shape index: {}]   ;;  %s3727_s13 = inlined_call_operand.hbm [shape: f32[128,128], index: 13, kind: input, shape index: {}]   ;;  %s3728_s14 = inlined_call_operand.hbm [shape: f32[1,128], index: 14, kind: input, shape index: {}]   ;;  %s3729_s15 = inlined_call_operand.hbm [shape: f32[4,128], index: 15, kind: output, shape index: {}]  }
   0x1   :  { %21 = vsyncpa [#allocation6], 0 }
   0x2   :  { %22 = vsyncpa [#allocation9], 0 }
   0x3   :  { %23 = vsyncpa [#allocation12], 0 }
   0x4   :  { %24 = vsyncpa [#allocation15], 0 }
   0x5   :  { %25 = vsyncpa [#allocation18], 0 }
   0x6   :  { %26 = vsyncpa [#allocation21], 0 }
   0x7   :  { %27 = vsyncpa [#allocation24], 0 }
   0x8   :  { %28 = vsyncpa [#allocation4], 0  ;;  %s2980_s18 = smov [#allocation5]   ;;  %s2610_s22 = scalar_lea.hbm %s3715_s1, 64 }
   0x9   :  { %s47_s19 = sshll.u32 %s2980_s18, 4  ;;  %p2611_p0 = scmp.ne.s32.totalorder %s3715_s1, %s2610_s22  ;;  %s48_s19 = int_to_ptr.vmem [resolvable:$true] %s47_s19 }
   0xa   :  { %p2614_p1 = scmp.lt.u32.totalorder %s2610_s22, %s3715_s1 }
   0xc   :  { %p2616_p2 = pnand %p2614_p1, %p2611_p0 }
   0xe   :  { %2619 = shalt.err (!%p2616_p2)
}
   0xf   :  { %s2620_s27 = scalar_lea.vmem %s48_s19, 64  ;;  %p2625_p4 = scmp.lt.s32.totalorder %s48_s19, %s48_s19 }
  0x10   :  { %p2621_p3 = scmp.ne.s32.totalorder %s48_s19, %s2620_s27  ;;  %p2626_p5 = scmp.lt.s32.totalorder %s2620_s27, %s2620_s27 }
  0x12   :  { %p2627_p6 = por %p2626_p5, %p2625_p4 }
  0x14   :  { %p2628_p7 = pnand %p2627_p6, %p2621_p3 }
  0x16   :  { %2631 = shalt.err (!%p2628_p7)
}
  0x17   :  { %50 = dma.hbm_to_vmem [thread:$0]  %s3715_s1, 64, %s48_s19, [#allocation6]  }
  0x18   :  { %s2981_s30 = smov [#allocation8]   ;;  %s2982_s17 = smov [#allocation11]  }
  0x19   :  { %s68_s16 = sshll.u32 %s2981_s30, 4  ;;  %s93_s18 = sshll.u32 %s2982_s17, 4  ;;  %s69_s16 = int_to_ptr.vmem [resolvable:$true] %s68_s16  ;;  %s94_s18 = int_to_ptr.vmem [resolvable:$true] %s93_s18 }
  0x1a   :  { %s2632_s22 = scalar_lea.hbm %s3717_s3, 2048 }
  0x1b   :  { %p2633_p8 = scmp.ne.s32.totalorder %s3717_s3, %s2632_s22  ;;  %p2636_p9 = scmp.lt.u32.totalorder %s2632_s22, %s3717_s3 }
  0x1d   :  { %p2638_p10 = pnand %p2636_p9, %p2633_p8 }
  0x1f   :  { %2641 = shalt.err (!%p2638_p10)
}
  0x20   :  { %s2642_s1 = scalar_lea.vmem %s69_s16, 2048  ;;  %p2647_p12 = scmp.lt.s32.totalorder %s69_s16, %s69_s16 }
  0x21   :  { %p2643_p11 = scmp.ne.s32.totalorder %s69_s16, %s2642_s1  ;;  %p2648_p13 = scmp.lt.s32.totalorder %s2642_s1, %s2642_s1 }
  0x23   :  { %p2649_p0 = por %p2648_p13, %p2647_p12 }
  0x25   :  { %p2650_p1 = pnand %p2649_p0, %p2643_p11 }
  0x27   :  { %2653 = shalt.err (!%p2650_p1)
}
  0x28   :  { %s2983_s19 = smov 128   ;;  %s2984_s27 = smov 8  }
  0x29   :  { %74 = dma.hbm_to_vmem [thread:$0]  %s3717_s3, 2048, %s69_s16, [#allocation9], %s2983_s19, %s2983_s19, %s2984_s27  }
  0x2a   :  { %s2654_s20 = scalar_lea.hbm %s3719_s5, 16 }
  0x2b   :  { %p2655_p2 = scmp.ne.s32.totalorder %s3719_s5, %s2654_s20  ;;  %p2658_p3 = scmp.lt.u32.totalorder %s2654_s20, %s3719_s5 }
  0x2d   :  { %p2660_p4 = pnand %p2658_p3, %p2655_p2 }
  0x2f   :  { %2663 = shalt.err (!%p2660_p4)
}
  0x30   :  { %s2664_s25 = scalar_lea.vmem %s94_s18, 16  ;;  %s2668_s26 = scalar_lea.vmem %s94_s18, 32 }
  0x31   :  { %p2665_p5 = scmp.ne.s32.totalorder %s94_s18, %s2664_s25  ;;  %p2669_p6 = scmp.lt.s32.totalorder %s94_s18, %s94_s18 }
  0x32   :  { %p2670_p7 = scmp.lt.s32.totalorder %s2668_s26, %s2664_s25 }
  0x34   :  { %p2671_p8 = por %p2670_p7, %p2669_p6 }
  0x36   :  { %p2672_p9 = pnand %p2671_p8, %p2665_p5 }
  0x38   :  { %2675 = shalt.err (!%p2672_p9)
}
  0x39   :  { %96 = dma.hbm_to_vmem [thread:$0]  %s3719_s5, 16, %s94_s18, [#allocation12]  }
  0x3a   :  { %s2985_s1 = smov [#allocation14]   ;;  %s2986_s29 = smov [#allocation17]  }
  0x3b   :  { %s113_s28 = sshll.u32 %s2985_s1, 4  ;;  %s134_s30 = sshll.u32 %s2986_s29, 4  ;;  %s114_s28 = int_to_ptr.vmem [resolvable:$true] %s113_s28  ;;  %s135_s30 = int_to_ptr.vmem [resolvable:$true] %s134_s30 }
  0x3c   :  { %s2676_s21 = scalar_lea.hbm %s3721_s7, 16 }
  0x3d   :  { %p2677_p10 = scmp.ne.s32.totalorder %s3721_s7, %s2676_s21  ;;  %p2680_p11 = scmp.lt.u32.totalorder %s2676_s21, %s3721_s7 }
  0x3f   :  { %p2682_p12 = pnand %p2680_p11, %p2677_p10 }
  0x41   :  { %2685 = shalt.err (!%p2682_p12)
}
  0x42   :  { %s2686_s5 = scalar_lea.vmem %s114_s28, 16  ;;  %s2690_s18 = scalar_lea.vmem %s114_s28, 32 }
  0x43   :  { %p2687_p13 = scmp.ne.s32.totalorder %s114_s28, %s2686_s5  ;;  %p2691_p0 = scmp.lt.s32.totalorder %s114_s28, %s114_s28 }
  0x44   :  { %p2692_p1 = scmp.lt.s32.totalorder %s2690_s18, %s2686_s5 }
  0x46   :  { %p2693_p2 = por %p2692_p1, %p2691_p0 }
  0x48   :  { %p2694_p3 = pnand %p2693_p2, %p2687_p13 }
  0x4a   :  { %2697 = shalt.err (!%p2694_p3)
}
  0x4b   :  { %116 = dma.hbm_to_vmem [thread:$0]  %s3721_s7, 16, %s114_s28, [#allocation15]  }
  0x4c   :  { %s2698_s29 = scalar_lea.hbm %s3723_s9, 2048 }
  0x4d   :  { %p2699_p4 = scmp.ne.s32.totalorder %s3723_s9, %s2698_s29  ;;  %p2702_p5 = scmp.lt.u32.totalorder %s2698_s29, %s3723_s9 }
  0x4f   :  { %p2704_p6 = pnand %p2702_p5, %p2699_p4 }
  0x51   :  { %2707 = shalt.err (!%p2704_p6)
}
  0x52   :  { %s2708_s23 = scalar_lea.vmem %s135_s30, 2048  ;;  %p2713_p8 = scmp.lt.s32.totalorder %s135_s30, %s135_s30 }
  0x53   :  { %p2709_p7 = scmp.ne.s32.totalorder %s135_s30, %s2708_s23  ;;  %p2714_p9 = scmp.lt.s32.totalorder %s2708_s23, %s2708_s23 }
  0x55   :  { %p2715_p10 = por %p2714_p9, %p2713_p8 }
  0x57   :  { %p2716_p11 = pnand %p2715_p10, %p2709_p7 }
  0x59   :  { %2719 = shalt.err (!%p2716_p11)
}
  0x5a   :  { %140 = dma.hbm_to_vmem [thread:$0]  %s3723_s9, 2048, %s135_s30, [#allocation18], %s2983_s19, %s2983_s19, %s2984_s27  }
  0x5b   :  { %s2987_s24 = smov [#allocation20]   ;;  %s2988_s5 = smov [#allocation23]  }
  0x5c   :  { %s157_s25 = sshll.u32 %s2987_s24, 4  ;;  %s176_s18 = sshll.u32 %s2988_s5, 4  ;;  %s158_s25 = int_to_ptr.vmem [resolvable:$true] %s157_s25  ;;  %s177_s18 = int_to_ptr.vmem [resolvable:$true] %s176_s18 }
  0x5d   :  { %s2720_s16 = scalar_lea.hbm %s3725_s11, 16 }
  0x5e   :  { %p2721_p12 = scmp.ne.s32.totalorder %s3725_s11, %s2720_s16  ;;  %p2724_p13 = scmp.lt.u32.totalorder %s2720_s16, %s3725_s11 }
  0x60   :  { %p2726_p0 = pnand %p2724_p13, %p2721_p12 }
  0x62   :  { %2729 = shalt.err (!%p2726_p0)
}
  0x63   :  { %s2730_s9 = scalar_lea.vmem %s158_s25, 16  ;;  %s2734_s30 = scalar_lea.vmem %s158_s25, 32 }
  0x64   :  { %p2731_p1 = scmp.ne.s32.totalorder %s158_s25, %s2730_s9  ;;  %p2735_p2 = scmp.lt.s32.totalorder %s158_s25, %s158_s25 }
  0x65   :  { %p2736_p3 = scmp.lt.s32.totalorder %s2734_s30, %s2730_s9 }
  0x67   :  { %p2737_p4 = por %p2736_p3, %p2735_p2 }
  0x69   :  { %p2738_p5 = pnand %p2737_p4, %p2731_p1 }
  0x6b   :  { %2741 = shalt.err (!%p2738_p5)
}
  0x6c   :  { %160 = dma.hbm_to_vmem [thread:$0]  %s3725_s11, 16, %s158_s25, [#allocation21]  }
  0x6d   :  { %s2742_s28 = scalar_lea.hbm %s3727_s13, 2048 }
  0x6e   :  { %p2743_p6 = scmp.ne.s32.totalorder %s3727_s13, %s2742_s28  ;;  %p2746_p7 = scmp.lt.u32.totalorder %s2742_s28, %s3727_s13 }
  0x70   :  { %p2748_p8 = pnand %p2746_p7, %p2743_p6 }
  0x72   :  { %2751 = shalt.err (!%p2748_p8)
}
  0x73   :  { %s2752_s16 = scalar_lea.vmem %s177_s18, 2048  ;;  %p2757_p10 = scmp.lt.s32.totalorder %s177_s18, %s177_s18 }
  0x74   :  { %p2753_p9 = scmp.ne.s32.totalorder %s177_s18, %s2752_s16  ;;  %p2758_p11 = scmp.lt.s32.totalorder %s2752_s16, %s2752_s16 }
  0x76   :  { %p2759_p12 = por %p2758_p11, %p2757_p10 }
  0x78   :  { %p2760_p13 = pnand %p2759_p12, %p2753_p9 }
  0x7a   :  { %2763 = shalt.err (!%p2760_p13)
}
  0x7b   :  { %182 = dma.hbm_to_vmem [thread:$0]  %s3727_s13, 2048, %s177_s18, [#allocation24], %s2983_s19, %s2983_s19, %s2984_s27  }
  0x7c   :  { %s2989_s1 = smov [#allocation2]   ;;  %s2990_s17 = smov [#allocation7]  }
  0x7d   :  { %s34_s29 = sshll.u32 %s2989_s1, 4  ;;  %s56_s20 = sshll.u32 %s2990_s17, 4  ;;  %s35_s29 = int_to_ptr.vmem [resolvable:$true] %s34_s29  ;;  %s57_s20 = int_to_ptr.vmem [resolvable:$true] %s56_s20 }
  0x7e   :  { %s2764_s21 = scalar_lea.hbm %s3714_s0, 2048 }
  0x7f   :  { %p2765_p0 = scmp.ne.s32.totalorder %s3714_s0, %s2764_s21  ;;  %p2768_p1 = scmp.lt.u32.totalorder %s2764_s21, %s3714_s0 }
  0x81   :  { %p2770_p2 = pnand %p2768_p1, %p2765_p0 }
  0x83   :  { %2773 = shalt.err (!%p2770_p2)
}
  0x84   :  { %s2774_s13 = scalar_lea.vmem %s35_s29, 2048  ;;  %p2779_p4 = scmp.lt.s32.totalorder %s35_s29, %s35_s29 }
  0x85   :  { %p2775_p3 = scmp.ne.s32.totalorder %s35_s29, %s2774_s13  ;;  %p2780_p5 = scmp.lt.s32.totalorder %s2774_s13, %s2774_s13 }
  0x87   :  { %p2781_p6 = por %p2780_p5, %p2779_p4 }
  0x89   :  { %p2782_p7 = pnand %p2781_p6, %p2775_p3 }
  0x8b   :  { %2785 = shalt.err (!%p2782_p7)
}
  0x8c   :  { %40 = dma.hbm_to_vmem [thread:$0]  %s3714_s0, 2048, %s35_s29, [#allocation3], %s2983_s19, %s2983_s19, %s2984_s27  }
  0x8d   :  { %s2786_s3 = scalar_lea.hbm %s3716_s2, 2048 }
  0x8e   :  { %p2787_p8 = scmp.ne.s32.totalorder %s3716_s2, %s2786_s3  ;;  %p2790_p9 = scmp.lt.u32.totalorder %s2786_s3, %s3716_s2 }
  0x90   :  { %p2792_p10 = pnand %p2790_p9, %p2787_p8 }
  0x92   :  { %2795 = shalt.err (!%p2792_p10)
}
  0x93   :  { %s2796_s17 = scalar_lea.vmem %s57_s20, 2048  ;;  %p2801_p12 = scmp.lt.s32.totalorder %s57_s20, %s57_s20 }
  0x94   :  { %p2797_p11 = scmp.ne.s32.totalorder %s57_s20, %s2796_s17  ;;  %p2802_p13 = scmp.lt.s32.totalorder %s2796_s17, %s2796_s17 }
  0x96   :  { %p2803_p0 = por %p2802_p13, %p2801_p12 }
  0x98   :  { %p2804_p1 = pnand %p2803_p0, %p2797_p11 }
  0x9a   :  { %2807 = shalt.err (!%p2804_p1)
}
  0x9b   :  { %62 = dma.hbm_to_vmem [thread:$0]  %s3716_s2, 2048, %s57_s20, [#allocation6], %s2983_s19, %s2983_s19, %s2984_s27  }
  0x9c   :  { %s2991_s9 = smov [#allocation10]   ;;  %s2992_s21 = smov [#allocation13]  }
  0x9d   :  { %s80_s30 = sshll.u32 %s2991_s9, 4  ;;  %s103_s22 = sshll.u32 %s2992_s21, 4  ;;  %s81_s30 = int_to_ptr.vmem [resolvable:$true] %s80_s30  ;;  %s104_s22 = int_to_ptr.vmem [resolvable:$true] %s103_s22 }
  0x9e   :  { %s2808_s28 = scalar_lea.hbm %s3718_s4, 2048 }
  0x9f   :  { %p2809_p2 = scmp.ne.s32.totalorder %s3718_s4, %s2808_s28  ;;  %p2812_p3 = scmp.lt.u32.totalorder %s2808_s28, %s3718_s4 }
  0xa1   :  { %p2814_p4 = pnand %p2812_p3, %p2809_p2 }
  0xa3   :  { %2817 = shalt.err (!%p2814_p4)
}
  0xa4   :  { %s2818_s2 = scalar_lea.vmem %s81_s30, 2048  ;;  %p2823_p6 = scmp.lt.s32.totalorder %s81_s30, %s81_s30 }
  0xa5   :  { %p2819_p5 = scmp.ne.s32.totalorder %s81_s30, %s2818_s2  ;;  %p2824_p7 = scmp.lt.s32.totalorder %s2818_s2, %s2818_s2 }
  0xa7   :  { %p2825_p8 = por %p2824_p7, %p2823_p6 }
  0xa9   :  { %p2826_p9 = pnand %p2825_p8, %p2819_p5 }
  0xab   :  { %2829 = shalt.err (!%p2826_p9)
}
  0xac   :  { %86 = dma.hbm_to_vmem [thread:$0]  %s3718_s4, 2048, %s81_s30, [#allocation9], %s2983_s19, %s2983_s19, %s2984_s27  }
  0xad   :  { %s2830_s11 = scalar_lea.hbm %s3720_s6, 16 }
  0xae   :  { %p2831_p10 = scmp.ne.s32.totalorder %s3720_s6, %s2830_s11  ;;  %p2834_p11 = scmp.lt.u32.totalorder %s2830_s11, %s3720_s6 }
  0xb0   :  { %p2836_p12 = pnand %p2834_p11, %p2831_p10 }
  0xb2   :  { %2839 = shalt.err (!%p2836_p12)
}
  0xb3   :  { %s2840_s29 = scalar_lea.vmem %s104_s22, 16  ;;  %s2844_s9 = scalar_lea.vmem %s104_s22, 32 }
  0xb4   :  { %p2841_p13 = scmp.ne.s32.totalorder %s104_s22, %s2840_s29  ;;  %p2845_p0 = scmp.lt.s32.totalorder %s104_s22, %s104_s22 }
  0xb5   :  { %p2846_p1 = scmp.lt.s32.totalorder %s2844_s9, %s2840_s29 }
  0xb7   :  { %p2847_p2 = por %p2846_p1, %p2845_p0 }
  0xb9   :  { %p2848_p3 = pnand %p2847_p2, %p2841_p13 }
  0xbb   :  { %2851 = shalt.err (!%p2848_p3)
}
  0xbc   :  { %106 = dma.hbm_to_vmem [thread:$0]  %s3720_s6, 16, %s104_s22, [#allocation12]  }
  0xbd   :  { %s2993_s21 = smov [#allocation16]   ;;  %s2994_s7 = smov [#allocation19]  }
  0xbe   :  { %s122_s23 = sshll.u32 %s2993_s21, 4  ;;  %s147_s28 = sshll.u32 %s2994_s7, 4  ;;  %s123_s23 = int_to_ptr.vmem [resolvable:$true] %s122_s23  ;;  %s148_s28 = int_to_ptr.vmem [resolvable:$true] %s147_s28 }
  0xbf   :  { %s2852_s24 = scalar_lea.hbm %s3722_s8, 2048 }
  0xc0   :  { %p2853_p4 = scmp.ne.s32.totalorder %s3722_s8, %s2852_s24  ;;  %p2856_p5 = scmp.lt.u32.totalorder %s2852_s24, %s3722_s8 }
  0xc2   :  { %p2858_p6 = pnand %p2856_p5, %p2853_p4 }
  0xc4   :  { %2861 = shalt.err (!%p2858_p6)
}
  0xc5   :  { %s2862_s6 = scalar_lea.vmem %s123_s23, 2048  ;;  %p2867_p8 = scmp.lt.s32.totalorder %s123_s23, %s123_s23 }
  0xc6   :  { %p2863_p7 = scmp.ne.s32.totalorder %s123_s23, %s2862_s6  ;;  %p2868_p9 = scmp.lt.s32.totalorder %s2862_s6, %s2862_s6 }
  0xc8   :  { %p2869_p10 = por %p2868_p9, %p2867_p8 }
  0xca   :  { %p2870_p11 = pnand %p2869_p10, %p2863_p7 }
  0xcc   :  { %2873 = shalt.err (!%p2870_p11)
}
  0xcd   :  { %128 = dma.hbm_to_vmem [thread:$0]  %s3722_s8, 2048, %s123_s23, [#allocation15], %s2983_s19, %s2983_s19, %s2984_s27  }
  0xce   :  { %s2874_s25 = scalar_lea.hbm %s3724_s10, 16 }
  0xcf   :  { %p2875_p12 = scmp.ne.s32.totalorder %s3724_s10, %s2874_s25  ;;  %p2878_p13 = scmp.lt.u32.totalorder %s2874_s25, %s3724_s10 }
  0xd1   :  { %p2880_p0 = pnand %p2878_p13, %p2875_p12 }
  0xd3   :  { %2883 = shalt.err (!%p2880_p0)
}
  0xd4   :  { %s2884_s9 = scalar_lea.vmem %s148_s28, 16  ;;  %s2888_s4 = scalar_lea.vmem %s148_s28, 32 }
  0xd5   :  { %p2885_p1 = scmp.ne.s32.totalorder %s148_s28, %s2884_s9  ;;  %p2889_p2 = scmp.lt.s32.totalorder %s148_s28, %s148_s28 }
  0xd6   :  { %p2890_p3 = scmp.lt.s32.totalorder %s2888_s4, %s2884_s9 }
  0xd8   :  { %p2891_p4 = por %p2890_p3, %p2889_p2 }
  0xda   :  { %p2892_p5 = pnand %p2891_p4, %p2885_p1 }
  0xdc   :  { %2895 = shalt.err (!%p2892_p5)
}
  0xdd   :  { %150 = dma.hbm_to_vmem [thread:$0]  %s3724_s10, 16, %s148_s28, [#allocation18]  }
  0xde   :  { %s2995_s27 = smov [#allocation22]   ;;  %s2996_s21 = smov [#allocation25]  }
  0xdf   :  { %s167_s30 = sshll.u32 %s2995_s27, 4  ;;  %s189_s23 = sshll.u32 %s2996_s21, 4  ;;  %s168_s30 = int_to_ptr.vmem [resolvable:$true] %s167_s30  ;;  %s190_s23 = int_to_ptr.vmem [resolvable:$true] %s189_s23 }
  0xe0   :  { %s2896_s18 = scalar_lea.hbm %s3726_s12, 16 }
  0xe1   :  { %p2897_p6 = scmp.ne.s32.totalorder %s3726_s12, %s2896_s18  ;;  %p2900_p7 = scmp.lt.u32.totalorder %s2896_s18, %s3726_s12 }
  0xe3   :  { %p2902_p8 = pnand %p2900_p7, %p2897_p6 }
  0xe5   :  { %2905 = shalt.err (!%p2902_p8)
}
  0xe6   :  { %s2906_s10 = scalar_lea.vmem %s168_s30, 16  ;;  %s2910_s28 = scalar_lea.vmem %s168_s30, 32 }
  0xe7   :  { %p2907_p9 = scmp.ne.s32.totalorder %s168_s30, %s2906_s10  ;;  %p2911_p10 = scmp.lt.s32.totalorder %s168_s30, %s168_s30 }
  0xe8   :  { %p2912_p11 = scmp.lt.s32.totalorder %s2910_s28, %s2906_s10 }
  0xea   :  { %p2913_p12 = por %p2912_p11, %p2911_p10 }
  0xec   :  { %p2914_p13 = pnand %p2913_p12, %p2907_p9 }
  0xee   :  { %2917 = shalt.err (!%p2914_p13)
}
  0xef   :  { %170 = dma.hbm_to_vmem [thread:$0]  %s3726_s12, 16, %s168_s30, [#allocation21]  }
  0xf0   :  { %s2918_s16 = scalar_lea.hbm %s3728_s14, 16 }
  0xf1   :  { %p2919_p0 = scmp.ne.s32.totalorder %s3728_s14, %s2918_s16  ;;  %p2922_p1 = scmp.lt.u32.totalorder %s2918_s16, %s3728_s14 }
  0xf3   :  { %p2924_p2 = pnand %p2922_p1, %p2919_p0 }
  0xf5   :  { %2927 = shalt.err (!%p2924_p2)
}
  0xf6   :  { %s2928_s0 = scalar_lea.vmem %s190_s23, 16  ;;  %s2932_s29 = scalar_lea.vmem %s190_s23, 32 }
  0xf7   :  { %p2929_p3 = scmp.ne.s32.totalorder %s190_s23, %s2928_s0  ;;  %p2933_p4 = scmp.lt.s32.totalorder %s190_s23, %s190_s23 }
  0xf8   :  { %p2934_p5 = scmp.lt.s32.totalorder %s2932_s29, %s2928_s0 }
  0xfa   :  { %p2935_p6 = por %p2934_p5, %p2933_p4 }
  0xfc   :  { %p2936_p7 = pnand %p2935_p6, %p2929_p3 }
  0xfe   :  { %2939 = shalt.err (!%p2936_p7)
}
  0xff   :  { %192 = dma.hbm_to_vmem [thread:$0]  %s3728_s14, 16, %s190_s23, [#allocation24]  }
 0x100   :  { %2962 = dma.done.wait [#allocation3], 2048  }
 0x101   :  { %2963 = vsyncadd [#allocation3], 4294965248 }
 0x102   :  { %2964 = dma.done.wait [#allocation6], 2112  }
 0x103   :  { %2965 = vsyncadd [#allocation6], 4294965184 }
 0x104   :  { %2966 = dma.done.wait [#allocation9], 4096  }
 0x105   :  { %2967 = vsyncadd [#allocation9], 4294963200 }
 0x106   :  { %2968 = dma.done.wait [#allocation12], 32  }
 0x107   :  { %2969 = vsyncadd [#allocation12], 4294967264 }
 0x108   :  { %2970 = dma.done.wait [#allocation15], 2064  }
 0x109   :  { %2971 = vsyncadd [#allocation15], 4294965232 }
 0x10a   :  { %2972 = dma.done.wait [#allocation18], 2064  }
 0x10b   :  { %2973 = vsyncadd [#allocation18], 4294965232 }
 0x10c   :  { %2974 = dma.done.wait [#allocation21], 32  }
 0x10d   :  { %2975 = vsyncadd [#allocation21], 4294967264 }
 0x10e   :  { %2976 = dma.done.wait [#allocation24], 2064  }
 0x10f   :  { %2977 = vsyncadd [#allocation24], 4294965232  ;;  %v238_v0 = vld [vmem:[#allocation7] sm:$0xff]  ;;  %v3282_v1 = vld [vmem:[#allocation7 + $0x8] sm:$0xff]  ;;  %vm2998_vm0 = vmmov 0   ;;  %s3000_s14 = smov [#allocation26]  }
 0x110   :  { %v3284_v2 = vld [vmem:[#allocation7 + $0x10] sm:$0xff]  ;;  %v2313_v3 = vpack.c.bf16 %v3282_v1, %v238_v0  ;;  %v3287_v4 = vld [vmem:[#allocation7 + $0x18] sm:$0xff]  ;;  %1995 = vmatprep.mubr.f32.mxu1 %v238_v0  ;;  %v3291_v6 = vld [vmem:[#allocation7 + $0x20] sm:$0xff]  ;;  %s1662_s4 = sshll.u32 %s3000_s14, 4  ;;  %s1663_s4 = int_to_ptr.vmem [resolvable:$true] %s1662_s4 }
 0x111   :  { %v2317_v5 = vpack.c.bf16 %v3287_v4, %v3284_v2  ;;  %v3293_v7 = vld [vmem:[#allocation7 + $0x28] sm:$0xff]  ;;  %v3297_v9 = vld [vmem:[#allocation2] sm:$0xff]  ;;  %v3299_v10 = vld [vmem:[#allocation7 + $0x30] sm:$0xff]  ;;  %s2940_s8 = scalar_lea.vmem %s1663_s4, 64  ;;  %p2945_p9 = scmp.lt.s32.totalorder %s1663_s4, %s1663_s4 }
 0x112   :  { %2314 = vmatprep.subr.bf16.mxu0 %v2313_v3  ;;  %v2321_v8 = vpack.c.bf16 %v3293_v7, %v3291_v6  ;;  %v3301_v11 = vld [vmem:[#allocation7 + $0x38] sm:$0xff]  ;;  %1939 = vmatprep.mubr.f32.mxu0 %v3297_v9  ;;  %v3306_v13 = vld [vmem:[#allocation7 + $0x40] sm:$0xff]  ;;  %v3308_v14 = vld [vmem:[#allocation7 + $0x48] sm:$0xff]  ;;  %p2941_p8 = scmp.ne.s32.totalorder %s1663_s4, %s2940_s8  ;;  %p2946_p10 = scmp.lt.s32.totalorder %s2940_s8, %s2940_s8 }
 0x113   :  { %2316 = vmatpush3.bf16.msra.mxu0 %v2313_v3  ;;  %v2325_v12 = vpack.c.bf16 %v3301_v11, %v3299_v10  ;;  %v431_v15 = vld [vmem:[#allocation10] sm:$0xff]  ;;  %v432_v16 = vld [vmem:[#allocation10 + $0x8] sm:$0xff]  ;;  %v433_v17 = vld [vmem:[#allocation10 + $0x10] sm:$0xff]  ;;  %v2329_v21 = vpack.c.bf16 %v3308_v14, %v3306_v13 }
 0x114   :  { %2318 = vmatprep.subr.bf16.mxu0 %v2317_v5  ;;  %v434_v18 = vld [vmem:[#allocation10 + $0x18] sm:$0xff]  ;;  %v2345_v19 = vpack.c.bf16 %v432_v16, %v431_v15  ;;  %v435_v22 = vld [vmem:[#allocation10 + $0x20] sm:$0xff]  ;;  %v436_v23 = vld [vmem:[#allocation10 + $0x28] sm:$0xff]  ;;  %p2947_p11 = por %p2946_p10, %p2945_p9 }
 0x115   :  { %v2349_v20 = vpack.c.bf16 %v434_v18, %v433_v17  ;;  %v3312_v24 = vld [vmem:[#allocation7 + $0x50] sm:$0xff]  ;;  %v3314_v25 = vld [vmem:[#allocation7 + $0x58] sm:$0xff]  ;;  %v2353_v26 = vpack.c.bf16 %v436_v23, %v435_v22  ;;  %v3318_v30 = vld [vmem:[#allocation7 + $0x60] sm:$0xff] }
 0x116   :  { %2346 = vmatprep.subr.bf16.mxu1 %v2345_v19  ;;  %v2333_v27 = vpack.c.bf16 %v3314_v25, %v3312_v24  ;;  %v437_v28 = vld [vmem:[#allocation10 + $0x30] sm:$0xff]  ;;  %v438_v29 = vld [vmem:[#allocation10 + $0x38] sm:$0xff]  ;;  %v3320_v31 = vld [vmem:[#allocation7 + $0x68] sm:$0xff]  ;;  %p2948_p12 = pnand %p2947_p11, %p2941_p8 }
 0x117   :  { %2320 = vmatpush3.bf16.msra.mxu0 %v2317_v5  ;;  %2348 = vmatpush3.bf16.msra.mxu1 %v2345_v19  ;;  %v2357_v32 = vpack.c.bf16 %v438_v29, %v437_v28  ;;  %v2337_v33 = vpack.c.bf16 %v3320_v31, %v3318_v30  ;;  %v439_v34 = vld [vmem:[#allocation10 + $0x40] sm:$0xff]  ;;  %v440_v35 = vld [vmem:[#allocation10 + $0x48] sm:$0xff]  ;;  %v3324_v36 = vld [vmem:[#allocation7 + $0x70] sm:$0xff] }
 0x118   :  { %2322 = vmatprep.subr.bf16.mxu0 %v2321_v8  ;;  %2350 = vmatprep.subr.bf16.mxu1 %v2349_v20  ;;  %v3326_v37 = vld [vmem:[#allocation7 + $0x78] sm:$0xff]  ;;  %v2361_v38 = vpack.c.bf16 %v440_v35, %v439_v34  ;;  %v441_v40 = vld [vmem:[#allocation10 + $0x50] sm:$0xff]  ;;  %v443_v43 = vld [vmem:[#allocation10 + $0x60] sm:$0xff] }
 0x119   :  { %v2341_v39 = vpack.c.bf16 %v3326_v37, %v3324_v36  ;;  %v442_v41 = vld [vmem:[#allocation10 + $0x58] sm:$0xff]  ;;  %v444_v44 = vld [vmem:[#allocation10 + $0x68] sm:$0xff]  ;;  %v445_v48 = vld [vmem:[#allocation10 + $0x70] sm:$0xff] }
 0x11a   :  { %v2365_v42 = vpack.c.bf16 %v442_v41, %v441_v40  ;;  %v3330_v45 = vld [vmem:[#allocation2 + $0x8] sm:$0xff]  ;;  %v2369_v46 = vpack.c.bf16 %v444_v44, %v443_v43  ;;  %v3332_v47 = vld [vmem:[#allocation2 + $0x10] sm:$0xff]  ;;  %v446_v49 = vld [vmem:[#allocation10 + $0x78] sm:$0xff] }
 0x11b   :  { %2324 = vmatpush3.bf16.msra.mxu0 %v2321_v8  ;;  %2352 = vmatpush3.bf16.msra.mxu1 %v2349_v20  ;;  %v3336_v50 = vld [vmem:[#allocation2 + $0x18] sm:$0xff]  ;;  %v2373_v51 = vpack.c.bf16 %v446_v49, %v445_v48  ;;  %v3338_v52 = vld [vmem:[#allocation2 + $0x20] sm:$0xff]  ;;  %v416_v54 = vld [vmem:[#allocation8 + $0x8] sm:$0xff] }
 0x11c   :  { %2326 = vmatprep.subr.bf16.mxu0 %v2325_v12  ;;  %2354 = vmatprep.subr.bf16.mxu1 %v2353_v26  ;;  %v415_v53 = vld [vmem:[#allocation8] sm:$0xff]  ;;  %v3344_v57 = vld [vmem:[#allocation2 + $0x30] sm:$0xff]  ;;  %v418_v59 = vld [vmem:[#allocation8 + $0x18] sm:$0xff] }
 0x11d   :  { %v3342_v55 = vld [vmem:[#allocation2 + $0x28] sm:$0xff]  ;;  %v2377_v56 = vpack.c.bf16 %v416_v54, %v415_v53  ;;  %v417_v58 = vld [vmem:[#allocation8 + $0x10] sm:$0xff]  ;;  %v3350_v61 = vld [vmem:[#allocation2 + $0x40] sm:$0xff] }
 0x11e   :  { %v3348_v60 = vld [vmem:[#allocation2 + $0x38] sm:$0xff]  ;;  %v2381_v62 = vpack.c.bf16 %v418_v59, %v417_v58  ;;  %v419_v63 = vld [vmem:[#allocation8 + $0x20] sm:$0xff]  ;;  %v420_v0 = vld [vmem:[#allocation8 + $0x28] sm:$0xff] }
 0x11f   :  { %2328 = vmatpush3.bf16.msra.mxu0 %v2325_v12  ;;  %2356 = vmatpush3.bf16.msra.mxu1 %v2353_v26  ;;  %v3355_v3 = vld [vmem:[#allocation2 + $0x48] sm:$0xff]  ;;  %v3358_v5 = vld [vmem:[#allocation2 + $0x50] sm:$0xff]  ;;  %v2385_v8 = vpack.c.bf16 %v420_v0, %v419_v63  ;;  %v422_v15 = vld [vmem:[#allocation8 + $0x38] sm:$0xff] }
 0x120   :  { %2330 = vmatprep.subr.bf16.mxu0 %v2329_v21  ;;  %2358 = vmatprep.subr.bf16.mxu1 %v2357_v32  ;;  %v421_v12 = vld [vmem:[#allocation8 + $0x30] sm:$0xff]  ;;  %v3366_v16 = vld [vmem:[#allocation2 + $0x60] sm:$0xff]  ;;  %v424_v18 = vld [vmem:[#allocation8 + $0x48] sm:$0xff] }
 0x121   :  { %v423_v17 = vld [vmem:[#allocation8 + $0x40] sm:$0xff]  ;;  %v3374_v19 = vld [vmem:[#allocation2 + $0x70] sm:$0xff] }
 0x122   :  { %v425_v20 = vld [vmem:[#allocation8 + $0x50] sm:$0xff]  ;;  %v428_v23 = vld [vmem:[#allocation8 + $0x68] sm:$0xff]  ;;  %v1678_v40 = vld [vmem:[#allocation11] ss:$0 sm:$0xff] }
 0x123   :  { %2332 = vmatpush3.bf16.msra.mxu0 %v2329_v21  ;;  %2360 = vmatpush3.bf16.msra.mxu1 %v2357_v32  ;;  %v426_v21 = vld [vmem:[#allocation8 + $0x58] sm:$0xff]  ;;  %v429_v26 = vld [vmem:[#allocation8 + $0x70] sm:$0xff] }
 0x124   :  { %2334 = vmatprep.subr.bf16.mxu0 %v2333_v27  ;;  %2362 = vmatprep.subr.bf16.mxu1 %v2361_v38  ;;  %v2397_v22 = vpack.c.bf16 %v426_v21, %v425_v20 }
 0x127   :  { %2336 = vmatpush3.bf16.msra.mxu0 %v2333_v27  ;;  %2364 = vmatpush3.bf16.msra.mxu1 %v2361_v38  ;;  %v430_v27 = vld [vmem:[#allocation8 + $0x78] sm:$0xff] }
 0x128   :  { %2338 = vmatprep.subr.bf16.mxu0 %v2337_v33  ;;  %2366 = vmatprep.subr.bf16.mxu1 %v2365_v42 }
 0x12b   :  { %2340 = vmatpush3.bf16.msra.mxu0 %v2337_v33  ;;  %2368 = vmatpush3.bf16.msra.mxu1 %v2365_v42 }
 0x12c   :  { %2342 = vmatprep.subr.bf16.mxu0 %v2341_v39  ;;  %2370 = vmatprep.subr.bf16.mxu1 %v2369_v46 }
 0x12f   :  { %2344 = vmatpush3.bf16.msra.mxu0 %v2341_v39  ;;  %2372 = vmatpush3.bf16.msra.mxu1 %v2369_v46 }
 0x130   :  { %2374 = vmatprep.subr.bf16.mxu1 %v2373_v51 }
 0x132   :  { %1940 = vmatmul.mubr.f32.vlgmr.msra.gmra.mrb[0].mxu0 %v3330_v45 }
 0x133   :  { %1942 = vmatprep.mubr.f32.mxu0 %v3332_v47  ;;  %2376 = vmatpush3.bf16.msra.mxu1 %v2373_v51 }
 0x134   :  { %2378 = vmatprep.subr.bf16.mxu1 %v2377_v56 }
 0x136   :  { %1943 = vmatmul.mubr.f32.gmra.mrb[2].mxu0 %v3336_v50  ;;  %1996 = vmatmul.mubr.f32.vlgmr.msra.gmra.mrb[0].mxu1 %v3282_v1  ;;  %v3363_v1 = vld [vmem:[#allocation2 + $0x58] sm:$0xff] }
 0x137   :  { %1945 = vmatprep.mubr.f32.mxu0 %v3338_v52  ;;  %2380 = vmatpush3.bf16.msra.mxu1 %v2377_v56 }
 0x138   :  { %1998 = vmatprep.mubr.f32.mxu1 %v3284_v2  ;;  %2382 = vmatprep.subr.bf16.mxu1 %v2381_v62  ;;  %v2389_v2 = vpack.c.bf16 %v422_v15, %v421_v12 }
 0x13a   :  { %1946 = vmatmul.mubr.f32.gmra.mrb[4].mxu0 %v3342_v55  ;;  %1999 = vmatmul.mubr.f32.gmra.mrb[2].mxu1 %v3287_v4  ;;  %v3371_v4 = vld [vmem:[#allocation2 + $0x68] sm:$0xff] }
 0x13b   :  { %1948 = vmatprep.mubr.f32.mxu0 %v3344_v57  ;;  %2384 = vmatpush3.bf16.msra.mxu1 %v2381_v62 }
 0x13c   :  { %2001 = vmatprep.mubr.f32.mxu1 %v3291_v6  ;;  %2386 = vmatprep.subr.bf16.mxu1 %v2385_v8  ;;  %v2393_v6 = vpack.c.bf16 %v424_v18, %v423_v17 }
 0x13e   :  { %1949 = vmatmul.mubr.f32.gmra.mrb[6].mxu0 %v3348_v60  ;;  %2002 = vmatmul.mubr.f32.gmra.mrb[4].mxu1 %v3293_v7  ;;  %v3379_v7 = vld [vmem:[#allocation2 + $0x78] sm:$0xff] }
 0x13f   :  { %1951 = vmatprep.mubr.f32.mxu0 %v3350_v61  ;;  %2388 = vmatpush3.bf16.msra.mxu1 %v2385_v8 }
 0x140   :  { %2004 = vmatprep.mubr.f32.mxu1 %v3299_v10  ;;  %2390 = vmatprep.subr.bf16.mxu1 %v2389_v2  ;;  %v427_v10 = vld [vmem:[#allocation8 + $0x60] sm:$0xff] }
 0x142   :  { %1952 = vmatmul.mubr.f32.gmra.mrb[8].mxu0 %v3355_v3  ;;  %2005 = vmatmul.mubr.f32.gmra.mrb[6].mxu1 %v3301_v11  ;;  %v2401_v11 = vpack.c.bf16 %v428_v23, %v427_v10 }
 0x143   :  { %1954 = vmatprep.mubr.f32.mxu0 %v3358_v5  ;;  %2392 = vmatpush3.bf16.msra.mxu1 %v2389_v2 }
 0x144   :  { %2007 = vmatprep.mubr.f32.mxu1 %v3306_v13  ;;  %2394 = vmatprep.subr.bf16.mxu1 %v2393_v6  ;;  %v2405_v13 = vpack.c.bf16 %v430_v27, %v429_v26 }
 0x146   :  { %1955 = vmatmul.mubr.f32.gmra.mrb[10].mxu0 %v3363_v1  ;;  %2008 = vmatmul.mubr.f32.gmra.mrb[8].mxu1 %v3308_v14 }
 0x147   :  { %1957 = vmatprep.mubr.f32.mxu0 %v3366_v16  ;;  %2396 = vmatpush3.bf16.msra.mxu1 %v2393_v6 }
 0x148   :  { %2010 = vmatprep.mubr.f32.mxu1 %v3312_v24  ;;  %2398 = vmatprep.subr.bf16.mxu1 %v2397_v22 }
 0x14a   :  { %1958 = vmatmul.mubr.f32.gmra.mrb[12].mxu0 %v3371_v4  ;;  %2011 = vmatmul.mubr.f32.gmra.mrb[10].mxu1 %v3314_v25 }
 0x14b   :  { %1960 = vmatprep.mubr.f32.mxu0 %v3374_v19  ;;  %2400 = vmatpush3.bf16.msra.mxu1 %v2397_v22 }
 0x14c   :  { %2013 = vmatprep.mubr.f32.mxu1 %v3318_v30  ;;  %2402 = vmatprep.subr.bf16.mxu1 %v2401_v11 }
 0x14e   :  { %1961 = vmatmul.mubr.f32.gmra.mrb[14].mxu0 %v3379_v7  ;;  %2014 = vmatmul.mubr.f32.gmra.mrb[12].mxu1 %v3320_v31 }
 0x14f   :  { %2107 = vmatprep.mubr.f32.mxu0 %v3297_v9  ;;  %2404 = vmatpush3.bf16.msra.mxu1 %v2401_v11 }
 0x150   :  { %2016 = vmatprep.mubr.f32.mxu1 %v3324_v36  ;;  %2406 = vmatprep.subr.bf16.mxu1 %v2405_v13 }
 0x152   :  { %2017 = vmatmul.mubr.f32.gmra.mrb[14].mxu1 %v3326_v37 }
 0x153   :  { %2408 = vmatpush3.bf16.msra.mxu1 %v2405_v13 }
 0x205   :  { %v1941_v14 = vpop.f32.mrb[0].mxu0 }
 0x206   :  { %v336_v24 = vpop.f32.mrb[1].mxu0 }
 0x207   :  { %2051 = vmatprep.mubr.f32.mxu1 %v336_v24 }
 0x208   :  { %2052 = vmatmul.mubr.f32.vlgmr.msra.gmra.mrb[0].mxu1 %v1941_v14 }
 0x209   :  { %v1944_v9 = vpop.f32.mrb[2].mxu0 }
 0x20a   :  { %v346_v25 = vpop.f32.mrb[3].mxu0 }
 0x20b   :  { %2054 = vmatprep.mubr.f32.mxu1 %v346_v25 }
 0x20c   :  { %2055 = vmatmul.mubr.f32.gmra.mrb[2].mxu1 %v1944_v9 }
 0x20d   :  { %v1947_v28 = vpop.f32.mrb[4].mxu0 }
 0x20e   :  { %v356_v29 = vpop.f32.mrb[5].mxu0 }
 0x20f   :  { %2057 = vmatprep.mubr.f32.mxu1 %v356_v29 }
 0x210   :  { %2058 = vmatmul.mubr.f32.gmra.mrb[4].mxu1 %v1947_v28 }
 0x211   :  { %v1950_v30 = vpop.f32.mrb[6].mxu0 }
 0x212   :  { %v366_v31 = vpop.f32.mrb[7].mxu0 }
 0x213   :  { %2060 = vmatprep.mubr.f32.mxu1 %v366_v31 }
 0x214   :  { %2061 = vmatmul.mubr.f32.gmra.mrb[6].mxu1 %v1950_v30 }
 0x215   :  { %v1953_v32 = vpop.f32.mrb[8].mxu0 }
 0x216   :  { %v376_v33 = vpop.f32.mrb[9].mxu0 }
 0x217   :  { %2063 = vmatprep.mubr.f32.mxu1 %v376_v33 }
 0x218   :  { %2064 = vmatmul.mubr.f32.gmra.mrb[8].mxu1 %v1953_v32 }
 0x219   :  { %v1956_v34 = vpop.f32.mrb[10].mxu0 }
 0x21a   :  { %v386_v35 = vpop.f32.mrb[11].mxu0 }
 0x21b   :  { %2066 = vmatprep.mubr.f32.mxu1 %v386_v35 }
 0x21c   :  { %2067 = vmatmul.mubr.f32.gmra.mrb[10].mxu1 %v1956_v34 }
 0x21d   :  { %v1959_v36 = vpop.f32.mrb[12].mxu0 }
 0x21e   :  { %v396_v37 = vpop.f32.mrb[13].mxu0 }
 0x21f   :  { %2069 = vmatprep.mubr.f32.mxu1 %v396_v37 }
 0x220   :  { %2070 = vmatmul.mubr.f32.gmra.mrb[12].mxu1 %v1959_v36 }
 0x221   :  { %v1962_v38 = vpop.f32.mrb[14].mxu0 }
 0x222   :  { %v406_v39 = vpop.f32.mrb[15].mxu0 }
 0x223   :  { %2072 = vmatprep.mubr.f32.mxu1 %v406_v39 }
 0x224   :  { %2073 = vmatmul.mubr.f32.gmra.mrb[14].mxu1 %v1962_v38 }
 0x2db   :  { %v2053_v41 = vpop.f32.mrb[0].mxu1 }
 0x2dc   :  { %v745_v42 = vadd.f32 %v2053_v41, %v1678_v40  ;;  %v658_v43 = vpop.f32.mrb[1].mxu1 }
 0x2dd   :  { %v744_v44 = vadd.f32 %v1678_v40, %v658_v43 }
 0x2de   :  { %v3391_v46 = vmax.f32 %v745_v42, 0.0 }
 0x2df   :  { %v3393_v48 = vmax.f32 %v744_v44, 0.0  ;;  %v2056_v49 = vpop.f32.mrb[2].mxu1 }
 0x2e0   :  { %v668_v51 = vpop.f32.mrb[3].mxu1  ;;  %v747_v53 = vadd.f32 %v2056_v49, %v1678_v40 }
 0x2e1   :  { %v746_v54 = vadd.f32 %v1678_v40, %v668_v51  ;;  %v776_v56 = vadd.f32 %v3391_v46, %v3393_v48 }
 0x2e2   :  { %v3399_v63 = vmax.f32 %v747_v53, 0.0 }
 0x2e3   :  { %v3397_v58 = vmax.f32 %v746_v54, 0.0  ;;  %v2059_v59 = vpop.f32.mrb[4].mxu1 }
 0x2e4   :  { %v678_v62 = vpop.f32.mrb[5].mxu1  ;;  %v749_v8 = vadd.f32 %v2059_v59, %v1678_v40 }
 0x2e5   :  { %v777_v0 = vadd.f32 %v776_v56, %v3397_v58  ;;  %v748_v12 = vadd.f32 %v1678_v40, %v678_v62 }
 0x2e6   :  { %v3405_v6 = vmax.f32 %v749_v8, 0.0 }
 0x2e7   :  { %v3402_v15 = vmax.f32 %v748_v12, 0.0  ;;  %v778_v2 = vadd.f32 %v777_v0, %v3399_v63  ;;  %v2062_v17 = vpop.f32.mrb[6].mxu1 }
 0x2e8   :  { %v688_v18 = vpop.f32.mrb[7].mxu1  ;;  %v751_v21 = vadd.f32 %v2062_v17, %v1678_v40 }
 0x2e9   :  { %v779_v20 = vadd.f32 %v778_v2, %v3402_v15  ;;  %v750_v22 = vadd.f32 %v1678_v40, %v688_v18 }
 0x2ea   :  { %v3411_v27 = vmax.f32 %v751_v21, 0.0 }
 0x2eb   :  { %v3408_v10 = vmax.f32 %v750_v22, 0.0  ;;  %v780_v23 = vadd.f32 %v779_v20, %v3405_v6  ;;  %v2065_v11 = vpop.f32.mrb[8].mxu1 }
 0x2ec   :  { %v698_v26 = vpop.f32.mrb[9].mxu1  ;;  %v753_v14 = vadd.f32 %v2065_v11, %v1678_v40 }
 0x2ed   :  { %v781_v13 = vadd.f32 %v780_v23, %v3408_v10  ;;  %v752_v24 = vadd.f32 %v1678_v40, %v698_v26 }
 0x2ee   :  { %v3417_v30 = vmax.f32 %v753_v14, 0.0 }
 0x2ef   :  { %v3414_v9 = vmax.f32 %v752_v24, 0.0  ;;  %v782_v25 = vadd.f32 %v781_v13, %v3411_v27  ;;  %v2068_v28 = vpop.f32.mrb[10].mxu1 }
 0x2f0   :  { %v708_v29 = vpop.f32.mrb[11].mxu1  ;;  %v755_v32 = vadd.f32 %v2068_v28, %v1678_v40 }
 0x2f1   :  { %v783_v31 = vadd.f32 %v782_v25, %v3414_v9  ;;  %v754_v33 = vadd.f32 %v1678_v40, %v708_v29 }
 0x2f2   :  { %v3423_v38 = vmax.f32 %v755_v32, 0.0 }
 0x2f3   :  { %v3420_v34 = vmax.f32 %v754_v33, 0.0  ;;  %v784_v35 = vadd.f32 %v783_v31, %v3417_v30  ;;  %v2071_v36 = vpop.f32.mrb[12].mxu1 }
 0x2f4   :  { %v718_v37 = vpop.f32.mrb[13].mxu1  ;;  %v757_v41 = vadd.f32 %v2071_v36, %v1678_v40 }
 0x2f5   :  { %v785_v39 = vadd.f32 %v784_v35, %v3420_v34  ;;  %v756_v42 = vadd.f32 %v1678_v40, %v718_v37 }
 0x2f6   :  { %v3429_v53 = vmax.f32 %v757_v41, 0.0 }
 0x2f7   :  { %v3426_v43 = vmax.f32 %v756_v42, 0.0  ;;  %v786_v44 = vadd.f32 %v785_v39, %v3423_v38  ;;  %v2074_v49 = vpop.f32.mrb[14].mxu1 }
 0x2f8   :  { %v728_v51 = vpop.f32.mrb[15].mxu1  ;;  %v759_v56 = vadd.f32 %v2074_v49, %v1678_v40 }
 0x2f9   :  { %v787_v54 = vadd.f32 %v786_v44, %v3426_v43  ;;  %v758_v59 = vadd.f32 %v1678_v40, %v728_v51 }
 0x2fa   :  { %v3435_v8 = vmax.f32 %v759_v56, 0.0 }
 0x2fb   :  { %v3432_v62 = vmax.f32 %v758_v59, 0.0  ;;  %v788_v0 = vadd.f32 %v787_v54, %v3429_v53 }
 0x2fd   :  { %v789_v12 = vadd.f32 %v788_v0, %v3432_v62 }
 0x2ff   :  { %v790_v2 = vadd.f32 %v789_v12, %v3435_v8 }
 0x301   :  { %v791_v17 = vrot.slane %v790_v2, 4 }
 0x303   :  { %v792_v18 = vadd.f32 %v791_v17, %v790_v2 }
 0x305   :  { %v793_v20 = vrot.slane %v792_v18, 2 }
 0x307   :  { %v794_v21 = vadd.f32 %v793_v20, %v792_v18 }
 0x309   :  { %v795_v22 = vrot.slane %v794_v21, 1 }
 0x30b   :  { %v796_v23 = vadd.f32 %v795_v22, %v794_v21 }
 0x30d   :  { %v3439_v11 = vmul.f32 0.0078125, %v796_v23 }
 0x30f   :  { %v799_v40 = vsub.f32 %v3393_v48, %v3439_v11  ;;  %v800_v26 = vsub.f32 %v3391_v46, %v3439_v11  ;;  %v801_v13 = vsub.f32 %v3397_v58, %v3439_v11  ;;  %v802_v25 = vsub.f32 %v3399_v63, %v3439_v11 }
 0x310   :  { %v803_v28 = vsub.f32 %v3402_v15, %v3439_v11  ;;  %v804_v32 = vsub.f32 %v3405_v6, %v3439_v11  ;;  %v805_v36 = vsub.f32 %v3408_v10, %v3439_v11  ;;  %v806_v41 = vsub.f32 %v3411_v27, %v3439_v11 }
 0x311   :  { %v815_v14 = vmul.f32 %v799_v40, %v799_v40  ;;  %v816_v24 = vmul.f32 %v800_v26, %v800_v26  ;;  %v817_v29 = vmul.f32 %v801_v13, %v801_v13  ;;  %v818_v33 = vmul.f32 %v802_v25, %v802_v25 }
 0x312   :  { %v819_v37 = vmul.f32 %v803_v28, %v803_v28  ;;  %v820_v42 = vmul.f32 %v804_v32, %v804_v32  ;;  %v807_v49 = vsub.f32 %v3414_v9, %v3439_v11  ;;  %v821_v51 = vmul.f32 %v805_v36, %v805_v36 }
 0x313   :  { %v831_v31 = vadd.f32 %v816_v24, %v815_v14  ;;  %v808_v56 = vsub.f32 %v3417_v30, %v3439_v11  ;;  %v822_v59 = vmul.f32 %v806_v41, %v806_v41  ;;  %v809_v12 = vsub.f32 %v3420_v34, %v3439_v11 }
 0x314   :  { %v823_v2 = vmul.f32 %v807_v49, %v807_v49  ;;  %v810_v18 = vsub.f32 %v3423_v38, %v3439_v11  ;;  %v811_v22 = vsub.f32 %v3426_v43, %v3439_v11  ;;  %v812_v26 = vsub.f32 %v3429_v53, %v3439_v11 }
 0x315   :  { %v832_v35 = vadd.f32 %v831_v31, %v817_v29  ;;  %v824_v20 = vmul.f32 %v808_v56, %v808_v56  ;;  %v825_v23 = vmul.f32 %v809_v12, %v809_v12  ;;  %v813_v24 = vsub.f32 %v3432_v62, %v3439_v11 }
 0x316   :  { %v826_v13 = vmul.f32 %v810_v18, %v810_v18  ;;  %v827_v25 = vmul.f32 %v811_v22, %v811_v22  ;;  %v814_v29 = vsub.f32 %v3435_v8, %v3439_v11  ;;  %v828_v31 = vmul.f32 %v812_v26, %v812_v26 }
 0x317   :  { %v833_v39 = vadd.f32 %v832_v35, %v818_v33  ;;  %v829_v33 = vmul.f32 %v813_v24, %v813_v24 }
 0x318   :  { %v830_v36 = vmul.f32 %v814_v29, %v814_v29 }
 0x319   :  { %v834_v44 = vadd.f32 %v833_v39, %v819_v37 }
 0x31b   :  { %v835_v54 = vadd.f32 %v834_v44, %v820_v42 }
 0x31d   :  { %v836_v0 = vadd.f32 %v835_v54, %v821_v51 }
 0x31f   :  { %v837_v17 = vadd.f32 %v836_v0, %v822_v59  ;;  %v861_v0 = vlaneseq }
 0x321   :  { %v838_v21 = vadd.f32 %v837_v17, %v823_v2  ;;  %v862_v12 = vshrl.u32 %v861_v0, 7  ;;  %v853_v2 = vld [vmem:[#allocation13] sm:$0x1] }
 0x323   :  { %v839_v40 = vadd.f32 %v838_v21, %v824_v20  ;;  %v3473_v17 = vsub.s32 0, %v862_v12  ;;  %v857_v21 = vld [vmem:[#allocation14] sm:$0x1] }
 0x325   :  { %v840_v14 = vadd.f32 %v839_v40, %v825_v23 }
 0x327   :  { %v841_v28 = vadd.f32 %v840_v14, %v826_v13 }
 0x329   :  { %v842_v32 = vadd.f32 %v841_v28, %v827_v25 }
 0x32b   :  { %v843_v35 = vadd.f32 %v842_v32, %v828_v31 }
 0x32d   :  { %v844_v37 = vadd.f32 %v843_v35, %v829_v33 }
 0x32f   :  { %v845_v39 = vadd.f32 %v844_v37, %v830_v36 }
 0x331   :  { %v846_v41 = vrot.slane %v845_v39, 4 }
 0x333   :  { %v847_v42 = vadd.f32 %v846_v41, %v845_v39 }
 0x335   :  { %v848_v44 = vrot.slane %v847_v42, 2 }
 0x337   :  { %v849_v49 = vadd.f32 %v848_v44, %v847_v42 }
 0x339   :  { %v850_v51 = vrot.slane %v849_v49, 1 }
 0x33b   :  { %v851_v54 = vadd.f32 %v850_v51, %v849_v49 }
 0x33d   :  { %v852_v56 = vmul.f32 0.0078125, %v851_v54 }
 0x33f   :  { %v854_v59 = vadd.f32 1e-05, %v852_v56 }
 0x341   :  { %2606 = vrsqrt.f32 %v854_v59 }
 0x34b   :  { %v2607_v18 = vpop.eup %2606 }
 0x34c   :  { %v856_v20 = vmul.f32 %v2607_v18, %v853_v2 }
 0x34e   :  { %v858_v22 = vmul.f32 %v856_v20, %v3439_v11  ;;  %v864_v23 = vrot.slane %v856_v20, %v3473_v17  ;;  %v1066_v20 = vld [vmem:[#allocation17 + $0x8] sm:$0xff] }
 0x350   :  { %v859_v40 = vsub.f32 %v857_v21, %v858_v22  ;;  %v866_v26 = vmul.f32 %v864_v23, %v3393_v48  ;;  %v867_v14 = vmul.f32 %v864_v23, %v3391_v46  ;;  %v868_v24 = vmul.f32 %v864_v23, %v3397_v58  ;;  %v1067_v22 = vld [vmem:[#allocation17 + $0x10] sm:$0xff] }
 0x351   :  { %v869_v25 = vmul.f32 %v864_v23, %v3399_v63  ;;  %v870_v48 = vmul.f32 %v864_v23, %v3402_v15  ;;  %v871_v33 = vmul.f32 %v864_v23, %v3405_v6  ;;  %v872_v35 = vmul.f32 %v864_v23, %v3408_v10 }
 0x352   :  { %v886_v13 = vrot.slane %v859_v40, %v3473_v17  ;;  %v873_v36 = vmul.f32 %v864_v23, %v3411_v27  ;;  %v874_v39 = vmul.f32 %v864_v23, %v3414_v9  ;;  %v875_v41 = vmul.f32 %v864_v23, %v3417_v30  ;;  %v1068_v40 = vld [vmem:[#allocation17 + $0x18] sm:$0xff] }
 0x353   :  { %v876_v27 = vmul.f32 %v864_v23, %v3420_v34  ;;  %v877_v49 = vmul.f32 %v864_v23, %v3423_v38  ;;  %v878_v30 = vmul.f32 %v864_v23, %v3426_v43  ;;  %v879_v56 = vmul.f32 %v864_v23, %v3429_v53  ;;  %v1065_v53 = vld [vmem:[#allocation17] sm:$0xff] }
 0x354   :  { %v3482_v28 = vadd.f32 %v886_v13, %v866_v26  ;;  %v3484_v29 = vadd.f32 %v886_v13, %v867_v14  ;;  %v3486_v31 = vadd.f32 %v886_v13, %v868_v24  ;;  %v3488_v11 = vadd.f32 %v886_v13, %v869_v25  ;;  %v1070_v26 = vld [vmem:[#allocation17 + $0x28] sm:$0xff]  ;;  %v1071_v14 = vld [vmem:[#allocation17 + $0x30] sm:$0xff]  ;;  %v1072_v24 = vld [vmem:[#allocation17 + $0x38] sm:$0xff] }
 0x355   :  { %v3496_v58 = vadd.f32 %v886_v13, %v870_v48  ;;  %v3498_v63 = vadd.f32 %v886_v13, %v871_v33  ;;  %v3504_v15 = vadd.f32 %v886_v13, %v872_v35  ;;  %v3506_v6 = vadd.f32 %v886_v13, %v873_v36  ;;  %v1074_v48 = vld [vmem:[#allocation17 + $0x48] sm:$0xff]  ;;  %v1076_v33 = vld [vmem:[#allocation17 + $0x58] sm:$0xff] }
 0x356   :  { %v2409_v32 = vpack.c.bf16 %v3484_v29, %v3482_v28  ;;  %v2413_v46 = vpack.c.bf16 %v3488_v11, %v3486_v31  ;;  %v3512_v44 = vadd.f32 %v886_v13, %v874_v39  ;;  %v3514_v10 = vadd.f32 %v886_v13, %v875_v41  ;;  %v1080_v35 = vld [vmem:[#allocation17 + $0x78] sm:$0xff]  ;;  %v1050_v36 = vld [vmem:[#allocation16 + $0x8] sm:$0xff] }
 0x357   :  { %v2417_v37 = vpack.c.bf16 %v3498_v63, %v3496_v58  ;;  %v2421_v42 = vpack.c.bf16 %v3506_v6, %v3504_v15  ;;  %v3520_v54 = vadd.f32 %v886_v13, %v876_v27  ;;  %v3522_v9 = vadd.f32 %v886_v13, %v877_v49  ;;  %v1054_v39 = vld [vmem:[#allocation16 + $0x28] sm:$0xff]  ;;  %v1056_v41 = vld [vmem:[#allocation16 + $0x38] sm:$0xff] }
 0x358   :  { %2410 = vmatprep.subr.bf16.mxu0 %v2409_v32  ;;  %v2425_v51 = vpack.c.bf16 %v3514_v10, %v3512_v44  ;;  %v3528_v0 = vadd.f32 %v886_v13, %v878_v30  ;;  %v3530_v34 = vadd.f32 %v886_v13, %v879_v56  ;;  %v880_v38 = vmul.f32 %v864_v23, %v3432_v62  ;;  %v1060_v27 = vld [vmem:[#allocation16 + $0x58] sm:$0xff]  ;;  %v1062_v49 = vld [vmem:[#allocation16 + $0x68] sm:$0xff] }
 0x359   :  { %2412 = vmatpush3.bf16.msra.mxu0 %v2409_v32  ;;  %v2429_v59 = vpack.c.bf16 %v3522_v9, %v3520_v54  ;;  %v881_v12 = vmul.f32 %v864_v23, %v3435_v8  ;;  %v2441_v62 = vpack.c.bf16 %v1066_v20, %v1065_v53  ;;  %v2445_v8 = vpack.c.bf16 %v1068_v40, %v1067_v22  ;;  %v1069_v23 = vld [vmem:[#allocation17 + $0x20] sm:$0xff] }
 0x35a   :  { %2414 = vmatprep.subr.bf16.mxu0 %v2413_v46  ;;  %v2433_v2 = vpack.c.bf16 %v3530_v34, %v3528_v0  ;;  %v3536_v18 = vadd.f32 %v886_v13, %v880_v38  ;;  %v2453_v25 = vpack.c.bf16 %v1072_v24, %v1071_v14  ;;  %v1073_v32 = vld [vmem:[#allocation17 + $0x40] sm:$0xff] }
 0x35b   :  { %v3538_v43 = vadd.f32 %v886_v13, %v881_v12  ;;  %v2449_v13 = vpack.c.bf16 %v1070_v26, %v1069_v23  ;;  %v3576_v22 = vld [vmem:[#allocation19] ss:$0 sm:$0xff] }
 0x35d   :  { %2416 = vmatpush3.bf16.msra.mxu0 %v2413_v46  ;;  %v2437_v21 = vpack.c.bf16 %v3538_v43, %v3536_v18  ;;  %v1078_v46 = vld [vmem:[#allocation17 + $0x68] sm:$0xff] }
 0x35e   :  { %2418 = vmatprep.subr.bf16.mxu0 %v2417_v37 }
 0x361   :  { %2420 = vmatpush3.bf16.msra.mxu0 %v2417_v37  ;;  %v1052_v37 = vld [vmem:[#allocation16 + $0x18] sm:$0xff] }
 0x362   :  { %2422 = vmatprep.subr.bf16.mxu0 %v2421_v42 }
 0x365   :  { %2424 = vmatpush3.bf16.msra.mxu0 %v2421_v42  ;;  %v1058_v42 = vld [vmem:[#allocation16 + $0x48] sm:$0xff] }
 0x366   :  { %2426 = vmatprep.subr.bf16.mxu0 %v2425_v51 }
 0x369   :  { %2428 = vmatpush3.bf16.msra.mxu0 %v2425_v51  ;;  %v1064_v51 = vld [vmem:[#allocation16 + $0x78] sm:$0xff] }
 0x36a   :  { %2430 = vmatprep.subr.bf16.mxu0 %v2429_v59 }
 0x36d   :  { %2432 = vmatpush3.bf16.msra.mxu0 %v2429_v59 }
 0x36e   :  { %2434 = vmatprep.subr.bf16.mxu0 %v2433_v2 }
 0x371   :  { %2436 = vmatpush3.bf16.msra.mxu0 %v2433_v2 }
 0x372   :  { %2438 = vmatprep.subr.bf16.mxu0 %v2437_v21 }
 0x375   :  { %2440 = vmatpush3.bf16.msra.mxu0 %v2437_v21  ;;  %v2997_v21 = vmov 0.0|0.0  }
 0x376   :  { %2442 = vmatprep.subr.bf16.mxu0 %v2441_v62  ;;  %2505 = vmatprep.subr.bf16.mxu1 %v2997_v21 }
 0x378   :  { %2108 = vmatmul.mubr.f32.vlgmr.msra.gmra.mrb[16].mxu0 %v3330_v45  ;;  %v2457_v45 = vpack.c.bf16 %v1074_v48, %v1073_v32 }
 0x379   :  { %2444 = vmatpush3.bf16.msra.mxu0 %v2441_v62  ;;  %2110 = vmatprep.mubr.f32.mxu0 %v3332_v47  ;;  %v1075_v47 = vld [vmem:[#allocation17 + $0x50] sm:$0xff]  ;;  %v2999_v62 = vmov 0.0  }
 0x37a   :  { %2446 = vmatprep.subr.bf16.mxu0 %v2445_v8  ;;  %2275 = vmatprep.mubr.msk.f32.mxu1 %vm2998_vm0, %v2999_v62 }
 0x37c   :  { %2111 = vmatmul.mubr.f32.gmra.mrb[18].mxu0 %v3336_v50  ;;  %v2461_v50 = vpack.c.bf16 %v1076_v33, %v1075_v47 }
 0x37d   :  { %2448 = vmatpush3.bf16.msra.mxu0 %v2445_v8  ;;  %2113 = vmatprep.mubr.f32.mxu0 %v3338_v52  ;;  %v1077_v52 = vld [vmem:[#allocation17 + $0x60] sm:$0xff] }
 0x37e   :  { %2450 = vmatprep.subr.bf16.mxu0 %v2449_v13 }
 0x380   :  { %2114 = vmatmul.mubr.f32.gmra.mrb[20].mxu0 %v3342_v55  ;;  %v2465_v55 = vpack.c.bf16 %v1078_v46, %v1077_v52 }
 0x381   :  { %2452 = vmatpush3.bf16.msra.mxu0 %v2449_v13  ;;  %2116 = vmatprep.mubr.f32.mxu0 %v3344_v57  ;;  %v1079_v57 = vld [vmem:[#allocation17 + $0x70] sm:$0xff] }
 0x382   :  { %2454 = vmatprep.subr.bf16.mxu0 %v2453_v25 }
 0x384   :  { %2117 = vmatmul.mubr.f32.gmra.mrb[22].mxu0 %v3348_v60  ;;  %v2469_v60 = vpack.c.bf16 %v1080_v35, %v1079_v57 }
 0x385   :  { %2456 = vmatpush3.bf16.msra.mxu0 %v2453_v25  ;;  %2119 = vmatprep.mubr.f32.mxu0 %v3350_v61  ;;  %v1049_v61 = vld [vmem:[#allocation16] sm:$0xff] }
 0x386   :  { %2458 = vmatprep.subr.bf16.mxu0 %v2457_v45 }
 0x388   :  { %2120 = vmatmul.mubr.f32.gmra.mrb[24].mxu0 %v3355_v3  ;;  %v2473_v3 = vpack.c.bf16 %v1050_v36, %v1049_v61 }
 0x389   :  { %2460 = vmatpush3.bf16.msra.mxu0 %v2457_v45  ;;  %2122 = vmatprep.mubr.f32.mxu0 %v3358_v5  ;;  %v1051_v5 = vld [vmem:[#allocation16 + $0x10] sm:$0xff] }
 0x38a   :  { %2462 = vmatprep.subr.bf16.mxu0 %v2461_v50 }
 0x38c   :  { %2123 = vmatmul.mubr.f32.gmra.mrb[26].mxu0 %v3363_v1  ;;  %v2477_v1 = vpack.c.bf16 %v1052_v37, %v1051_v5 }
 0x38d   :  { %2464 = vmatpush3.bf16.msra.mxu0 %v2461_v50  ;;  %2125 = vmatprep.mubr.f32.mxu0 %v3366_v16  ;;  %v1053_v16 = vld [vmem:[#allocation16 + $0x20] sm:$0xff] }
 0x38e   :  { %2466 = vmatprep.subr.bf16.mxu0 %v2465_v55 }
 0x390   :  { %2126 = vmatmul.mubr.f32.gmra.mrb[28].mxu0 %v3371_v4  ;;  %v2481_v4 = vpack.c.bf16 %v1054_v39, %v1053_v16 }
 0x391   :  { %2468 = vmatpush3.bf16.msra.mxu0 %v2465_v55  ;;  %2128 = vmatprep.mubr.f32.mxu0 %v3374_v19  ;;  %v1055_v19 = vld [vmem:[#allocation16 + $0x30] sm:$0xff] }
 0x392   :  { %2470 = vmatprep.subr.bf16.mxu0 %v2469_v60 }
 0x394   :  { %2129 = vmatmul.mubr.f32.gmra.mrb[30].mxu0 %v3379_v7  ;;  %v2485_v7 = vpack.c.bf16 %v1056_v41, %v1055_v19 }
 0x395   :  { %2472 = vmatpush3.bf16.msra.mxu0 %v2469_v60  ;;  %2163 = vmatprep.mubr.f32.mxu0 %v3482_v28  ;;  %v1057_v28 = vld [vmem:[#allocation16 + $0x40] sm:$0xff] }
 0x396   :  { %2474 = vmatprep.subr.bf16.mxu0 %v2473_v3 }
 0x398   :  { %2164 = vmatmul.mubr.f32.vlgmr.msra.gmra.mrb[32].mxu0 %v3484_v29  ;;  %v2489_v29 = vpack.c.bf16 %v1058_v42, %v1057_v28 }
 0x399   :  { %2166 = vmatprep.mubr.f32.mxu0 %v3486_v31  ;;  %2476 = vmatpush3.bf16.msra.mxu0 %v2473_v3  ;;  %v1059_v31 = vld [vmem:[#allocation16 + $0x50] sm:$0xff] }
 0x39a   :  { %2478 = vmatprep.subr.bf16.mxu0 %v2477_v1 }
 0x39c   :  { %2167 = vmatmul.mubr.f32.gmra.mrb[34].mxu0 %v3488_v11  ;;  %v2493_v11 = vpack.c.bf16 %v1060_v27, %v1059_v31 }
 0x39d   :  { %2169 = vmatprep.mubr.f32.mxu0 %v3496_v58  ;;  %2480 = vmatpush3.bf16.msra.mxu0 %v2477_v1  ;;  %v1061_v58 = vld [vmem:[#allocation16 + $0x60] sm:$0xff] }
 0x39e   :  { %2482 = vmatprep.subr.bf16.mxu0 %v2481_v4 }
 0x3a0   :  { %2170 = vmatmul.mubr.f32.gmra.mrb[36].mxu0 %v3498_v63  ;;  %v2497_v63 = vpack.c.bf16 %v1062_v49, %v1061_v58 }
 0x3a1   :  { %2172 = vmatprep.mubr.f32.mxu0 %v3504_v15  ;;  %2484 = vmatpush3.bf16.msra.mxu0 %v2481_v4  ;;  %v1063_v15 = vld [vmem:[#allocation16 + $0x70] sm:$0xff] }
 0x3a2   :  { %2486 = vmatprep.subr.bf16.mxu0 %v2485_v7 }
 0x3a4   :  { %2173 = vmatmul.mubr.f32.gmra.mrb[38].mxu0 %v3506_v6  ;;  %v2501_v6 = vpack.c.bf16 %v1064_v51, %v1063_v15 }
 0x3a5   :  { %2175 = vmatprep.mubr.f32.mxu0 %v3512_v44  ;;  %2488 = vmatpush3.bf16.msra.mxu0 %v2485_v7 }
 0x3a6   :  { %2490 = vmatprep.subr.bf16.mxu0 %v2489_v29 }
 0x3a8   :  { %2176 = vmatmul.mubr.f32.gmra.mrb[40].mxu0 %v3514_v10 }
 0x3a9   :  { %2178 = vmatprep.mubr.f32.mxu0 %v3520_v54  ;;  %2492 = vmatpush3.bf16.msra.mxu0 %v2489_v29 }
 0x3aa   :  { %2494 = vmatprep.subr.bf16.mxu0 %v2493_v11 }
 0x3ac   :  { %2179 = vmatmul.mubr.f32.gmra.mrb[42].mxu0 %v3522_v9 }
 0x3ad   :  { %2181 = vmatprep.mubr.f32.mxu0 %v3528_v0  ;;  %2496 = vmatpush3.bf16.msra.mxu0 %v2493_v11 }
 0x3ae   :  { %2498 = vmatprep.subr.bf16.mxu0 %v2497_v63 }
 0x3b0   :  { %2182 = vmatmul.mubr.f32.gmra.mrb[44].mxu0 %v3530_v34 }
 0x3b1   :  { %2184 = vmatprep.mubr.f32.mxu0 %v3536_v18  ;;  %2500 = vmatpush3.bf16.msra.mxu0 %v2497_v63 }
 0x3b2   :  { %2502 = vmatprep.subr.bf16.mxu0 %v2501_v6 }
 0x3b4   :  { %2185 = vmatmul.mubr.f32.gmra.mrb[46].mxu0 %v3538_v43 }
 0x3b5   :  { %2504 = vmatpush3.bf16.msra.mxu0 %v2501_v6 }
 0x44b   :  { %v2109_v44 = vpop.f32.mrb[16].mxu0 }
 0x44c   :  { %v970_v10 = vpop.f32.mrb[17].mxu0 }
 0x44d   :  { %2219 = vmatprep.mubr.f32.mxu0 %v970_v10 }
 0x44e   :  { %2220 = vmatmul.mubr.f32.vlgmr.msra.gmra.mrb[32].mxu0 %v2109_v44 }
 0x44f   :  { %v2112_v54 = vpop.f32.mrb[18].mxu0 }
 0x450   :  { %v980_v9 = vpop.f32.mrb[19].mxu0 }
 0x451   :  { %2222 = vmatprep.mubr.f32.mxu0 %v980_v9 }
 0x452   :  { %2223 = vmatmul.mubr.f32.gmra.mrb[34].mxu0 %v2112_v54 }
 0x453   :  { %v2115_v30 = vpop.f32.mrb[20].mxu0 }
 0x454   :  { %v990_v56 = vpop.f32.mrb[21].mxu0 }
 0x455   :  { %2225 = vmatprep.mubr.f32.mxu0 %v990_v56 }
 0x456   :  { %2226 = vmatmul.mubr.f32.gmra.mrb[36].mxu0 %v2115_v30 }
 0x457   :  { %v2118_v59 = vpop.f32.mrb[22].mxu0 }
 0x458   :  { %v1000_v0 = vpop.f32.mrb[23].mxu0 }
 0x459   :  { %2228 = vmatprep.mubr.f32.mxu0 %v1000_v0 }
 0x45a   :  { %2229 = vmatmul.mubr.f32.gmra.mrb[38].mxu0 %v2118_v59 }
 0x45b   :  { %v2121_v34 = vpop.f32.mrb[24].mxu0 }
 0x45c   :  { %v1010_v38 = vpop.f32.mrb[25].mxu0 }
 0x45d   :  { %2231 = vmatprep.mubr.f32.mxu0 %v1010_v38  ;;  %v1563_v38 = vld [vmem:[#allocation23 + $0x8] sm:$0xff] }
 0x45e   :  { %2232 = vmatmul.mubr.f32.gmra.mrb[40].mxu0 %v2121_v34  ;;  %v1562_v34 = vld [vmem:[#allocation23] sm:$0xff] }
 0x45f   :  { %v2124_v12 = vpop.f32.mrb[26].mxu0 }
 0x460   :  { %v1020_v2 = vpop.f32.mrb[27].mxu0 }
 0x461   :  { %2234 = vmatprep.mubr.f32.mxu0 %v1020_v2 }
 0x462   :  { %2235 = vmatmul.mubr.f32.gmra.mrb[42].mxu0 %v2124_v12 }
 0x463   :  { %v2127_v18 = vpop.f32.mrb[28].mxu0 }
 0x464   :  { %v1030_v43 = vpop.f32.mrb[29].mxu0 }
 0x465   :  { %2237 = vmatprep.mubr.f32.mxu0 %v1030_v43  ;;  %v1477_v43 = vld [vmem:[#allocation5] sm:$0xf] }
 0x466   :  { %2238 = vmatmul.mubr.f32.gmra.mrb[44].mxu0 %v2127_v18 }
 0x467   :  { %v2130_v53 = vpop.f32.mrb[30].mxu0 }
 0x468   :  { %v1040_v20 = vpop.f32.mrb[31].mxu0 }
 0x469   :  { %2240 = vmatprep.mubr.f32.mxu0 %v1040_v20  ;;  %v1564_v20 = vld [vmem:[#allocation23 + $0x10] sm:$0xff] }
 0x46a   :  { %2241 = vmatmul.mubr.f32.gmra.mrb[46].mxu0 %v2130_v53  ;;  %v2530_v53 = vpack.c.bf16 %v1563_v38, %v1562_v34 }
 0x521   :  { %v2221_v40 = vpop.f32.mrb[32].mxu0 }
 0x522   :  { %v3579_v8 = vadd.f32 %v2221_v40, %v3576_v22  ;;  %v1292_v23 = vpop.f32.mrb[33].mxu0  ;;  %v1565_v40 = vld [vmem:[#allocation23 + $0x18] sm:$0xff] }
 0x523   :  { %v3582_v26 = vadd.f32 %v3576_v22, %v1292_v23 }
 0x525   :  { %v1394_v13 = vadd.f32 %v3579_v8, %v3582_v26  ;;  %v2506_v14 = vpack.c.bf16 %v3579_v8, %v3582_v26  ;;  %v2224_v24 = vpop.f32.mrb[34].mxu0 }
 0x526   :  { %v3589_v25 = vadd.f32 %v2224_v24, %v3576_v22  ;;  %v1302_v32 = vpop.f32.mrb[35].mxu0  ;;  %v1567_v24 = vld [vmem:[#allocation23 + $0x28] sm:$0xff] }
 0x527   :  { %v3592_v48 = vadd.f32 %v3576_v22, %v1302_v32  ;;  %2507 = vmatpush3.bf16.msra.mxu1 %v2506_v14  ;;  %v1566_v14 = vld [vmem:[#allocation23 + $0x20] sm:$0xff] }
 0x528   :  { %2508 = vmatprep.subr.bf16.mxu1 %v2997_v21 }
 0x529   :  { %v1395_v45 = vadd.f32 %v1394_v13, %v3592_v48  ;;  %v2509_v47 = vpack.c.bf16 %v3589_v25, %v3592_v48  ;;  %v2227_v33 = vpop.f32.mrb[36].mxu0  ;;  %v2533_v13 = vpack.c.bf16 %v1565_v40, %v1564_v20 }
 0x52a   :  { %v3599_v50 = vadd.f32 %v2227_v33, %v3576_v22  ;;  %v1312_v52 = vpop.f32.mrb[37].mxu0  ;;  %v1568_v33 = vld [vmem:[#allocation23 + $0x30] sm:$0xff] }
 0x52b   :  { %v3602_v46 = vadd.f32 %v3576_v22, %v1312_v52  ;;  %v1396_v55 = vadd.f32 %v1395_v45, %v3589_v25  ;;  %2510 = vmatpush3.bf16.msra.mxu1 %v2509_v47  ;;  %v2536_v47 = vpack.c.bf16 %v1567_v24, %v1566_v14  ;;  %v1569_v52 = vld [vmem:[#allocation23 + $0x38] sm:$0xff] }
 0x52c   :  { %2511 = vmatprep.subr.bf16.mxu1 %v2997_v21 }
 0x52d   :  { %v1397_v57 = vadd.f32 %v1396_v55, %v3602_v46  ;;  %v2512_v35 = vpack.c.bf16 %v3599_v50, %v3602_v46  ;;  %v2230_v60 = vpop.f32.mrb[38].mxu0 }
 0x52e   :  { %v3610_v61 = vadd.f32 %v2230_v60, %v3576_v22  ;;  %v1322_v36 = vpop.f32.mrb[39].mxu0  ;;  %v1570_v60 = vld [vmem:[#allocation23 + $0x40] sm:$0xff] }
 0x52f   :  { %v3613_v3 = vadd.f32 %v3576_v22, %v1322_v36  ;;  %v1398_v5 = vadd.f32 %v1397_v57, %v3599_v50  ;;  %2513 = vmatpush3.bf16.msra.mxu1 %v2512_v35  ;;  %v2539_v35 = vpack.c.bf16 %v1569_v52, %v1568_v33  ;;  %v1571_v36 = vld [vmem:[#allocation23 + $0x48] sm:$0xff] }
 0x530   :  { %2514 = vmatprep.subr.bf16.mxu1 %v2997_v21 }
 0x531   :  { %v1399_v37 = vadd.f32 %v1398_v5, %v3613_v3  ;;  %v2515_v1 = vpack.c.bf16 %v3610_v61, %v3613_v3  ;;  %v2233_v16 = vpop.f32.mrb[40].mxu0  ;;  %v2542_v5 = vpack.c.bf16 %v1571_v36, %v1570_v60 }
 0x532   :  { %v3621_v39 = vadd.f32 %v2233_v16, %v3576_v22  ;;  %v1332_v4 = vpop.f32.mrb[41].mxu0 }
 0x533   :  { %v3624_v19 = vadd.f32 %v3576_v22, %v1332_v4  ;;  %v1400_v41 = vadd.f32 %v1399_v37, %v3610_v61  ;;  %2516 = vmatpush3.bf16.msra.mxu1 %v2515_v1 }
 0x534   :  { %2517 = vmatprep.subr.bf16.mxu1 %v2997_v21 }
 0x535   :  { %v1401_v7 = vadd.f32 %v1400_v41, %v3624_v19  ;;  %v2518_v28 = vpack.c.bf16 %v3621_v39, %v3624_v19  ;;  %v2236_v42 = vpop.f32.mrb[42].mxu0 }
 0x536   :  { %v3632_v29 = vadd.f32 %v2236_v42, %v3576_v22  ;;  %v1342_v31 = vpop.f32.mrb[43].mxu0 }
 0x537   :  { %v3635_v27 = vadd.f32 %v3576_v22, %v1342_v31  ;;  %v1402_v11 = vadd.f32 %v1401_v7, %v3621_v39  ;;  %2519 = vmatpush3.bf16.msra.mxu1 %v2518_v28 }
 0x538   :  { %2520 = vmatprep.subr.bf16.mxu1 %v2997_v21 }
 0x539   :  { %v1403_v58 = vadd.f32 %v1402_v11, %v3635_v27  ;;  %v2521_v49 = vpack.c.bf16 %v3632_v29, %v3635_v27  ;;  %v2239_v63 = vpop.f32.mrb[44].mxu0 }
 0x53a   :  { %v3643_v15 = vadd.f32 %v2239_v63, %v3576_v22  ;;  %v1352_v51 = vpop.f32.mrb[45].mxu0 }
 0x53b   :  { %v3646_v6 = vadd.f32 %v3576_v22, %v1352_v51  ;;  %v1404_v44 = vadd.f32 %v1403_v58, %v3632_v29  ;;  %2522 = vmatpush3.bf16.msra.mxu1 %v2521_v49  ;;  %v1575_v49 = vld [vmem:[#allocation23 + $0x68] sm:$0xff] }
 0x53c   :  { %2523 = vmatprep.subr.bf16.mxu1 %v2997_v21 }
 0x53d   :  { %v1405_v10 = vadd.f32 %v1404_v44, %v3646_v6  ;;  %v2524_v54 = vpack.c.bf16 %v3643_v15, %v3646_v6  ;;  %v2242_v9 = vpop.f32.mrb[46].mxu0 }
 0x53e   :  { %v1393_v30 = vadd.f32 %v2242_v9, %v3576_v22  ;;  %v1362_v56 = vpop.f32.mrb[47].mxu0 }
 0x53f   :  { %v1392_v59 = vadd.f32 %v3576_v22, %v1362_v56  ;;  %v1406_v0 = vadd.f32 %v1405_v10, %v3643_v15  ;;  %2525 = vmatpush3.bf16.msra.mxu1 %v2524_v54 }
 0x540   :  { %2526 = vmatprep.subr.bf16.mxu1 %v2997_v21 }
 0x541   :  { %v1407_v12 = vadd.f32 %v1406_v0, %v1392_v59  ;;  %v2527_v2 = vpack.c.bf16 %v1393_v30, %v1392_v59 }
 0x543   :  { %v1408_v18 = vadd.f32 %v1407_v12, %v1393_v30  ;;  %2528 = vmatpush3.bf16.msra.mxu1 %v2527_v2 }
 0x544   :  { %2529 = vmatprep.subr.bf16.mxu1 %v2997_v21 }
 0x545   :  { %v1409_v23 = vrot.slane %v1408_v18, 4 }
 0x546   :  { %2276 = vmatmul.mubr.f32.vlgmr.msra.gmra.mrb[16].mxu1 %v1477_v43 }
 0x547   :  { %v1410_v22 = vadd.f32 %v1409_v23, %v1408_v18  ;;  %2531 = vmatpush3.bf16.msra.mxu1 %v2530_v53  ;;  %2310 = vmatprep.mubr.msk.f32.mxu1 %vm2998_vm0, %v2999_v62 }
 0x548   :  { %2532 = vmatprep.subr.bf16.mxu1 %v2997_v21 }
 0x549   :  { %v1411_v32 = vrot.slane %v1410_v22, 2 }
 0x54b   :  { %v1412_v45 = vadd.f32 %v1411_v32, %v1410_v22  ;;  %2534 = vmatpush3.bf16.msra.mxu1 %v2533_v13 }
 0x54c   :  { %2535 = vmatprep.subr.bf16.mxu1 %v2997_v21 }
 0x54d   :  { %v1413_v55 = vrot.slane %v1412_v45, 1 }
 0x54f   :  { %v1414_v57 = vadd.f32 %v1413_v55, %v1412_v45  ;;  %2537 = vmatpush3.bf16.msra.mxu1 %v2536_v47 }
 0x550   :  { %2538 = vmatprep.subr.bf16.mxu1 %v2997_v21 }
 0x551   :  { %v3663_v62 = vmul.f32 0.0078125, %v1414_v57 }
 0x553   :  { %v1416_v37 = vsub.f32 %v3582_v26, %v3663_v62  ;;  %v1417_v1 = vsub.f32 %v3579_v8, %v3663_v62  ;;  %v1418_v16 = vsub.f32 %v3592_v48, %v3663_v62  ;;  %v1419_v4 = vsub.f32 %v3589_v25, %v3663_v62  ;;  %2540 = vmatpush3.bf16.msra.mxu1 %v2539_v35  ;;  %v1572_v8 = vld [vmem:[#allocation23 + $0x50] sm:$0xff]  ;;  %v1573_v48 = vld [vmem:[#allocation23 + $0x58] sm:$0xff] }
 0x554   :  { %v1420_v41 = vsub.f32 %v3602_v46, %v3663_v62  ;;  %v1421_v7 = vsub.f32 %v3599_v50, %v3663_v62  ;;  %v1422_v28 = vsub.f32 %v3613_v3, %v3663_v62  ;;  %v1423_v26 = vsub.f32 %v3610_v61, %v3663_v62  ;;  %2541 = vmatprep.subr.bf16.mxu1 %v2997_v21 }
 0x555   :  { %v1424_v25 = vsub.f32 %v3624_v19, %v3663_v62  ;;  %v1425_v42 = vsub.f32 %v3621_v39, %v3663_v62  ;;  %v1426_v46 = vsub.f32 %v3635_v27, %v3663_v62  ;;  %v1427_v50 = vsub.f32 %v3632_v29, %v3663_v62  ;;  %v1574_v27 = vld [vmem:[#allocation23 + $0x60] sm:$0xff] }
 0x556   :  { %v1428_v3 = vsub.f32 %v3646_v6, %v3663_v62  ;;  %v1429_v61 = vsub.f32 %v3643_v15, %v3663_v62  ;;  %v1430_v31 = vsub.f32 %v1392_v59, %v3663_v62  ;;  %v1431_v11 = vsub.f32 %v1393_v30, %v3663_v62 }
 0x557   :  { %v1432_v19 = vmul.f32 %v1416_v37, %v1416_v37  ;;  %v1433_v58 = vmul.f32 %v1417_v1, %v1417_v1  ;;  %2543 = vmatpush3.bf16.msra.mxu1 %v2542_v5  ;;  %v2545_v39 = vpack.c.bf16 %v1573_v48, %v1572_v8  ;;  %v1434_v63 = vmul.f32 %v1418_v16, %v1418_v16  ;;  %v1470_v5 = vld [vmem:[#allocation20] sm:$0x1] }
 0x558   :  { %2544 = vmatprep.subr.bf16.mxu1 %v2997_v21  ;;  %v2548_v51 = vpack.c.bf16 %v1575_v49, %v1574_v27  ;;  %v1435_v6 = vmul.f32 %v1419_v4, %v1419_v4  ;;  %v1436_v44 = vmul.f32 %v1420_v41, %v1420_v41  ;;  %v1437_v54 = vmul.f32 %v1421_v7, %v1421_v7  ;;  %v1576_v4 = vld [vmem:[#allocation23 + $0x70] sm:$0xff]  ;;  %v1577_v41 = vld [vmem:[#allocation23 + $0x78] sm:$0xff] }
 0x559   :  { %v1448_v29 = vadd.f32 %v1433_v58, %v1432_v19  ;;  %v1438_v30 = vmul.f32 %v1422_v28, %v1422_v28  ;;  %v1439_v59 = vmul.f32 %v1423_v26, %v1423_v26  ;;  %v1440_v34 = vmul.f32 %v1424_v25, %v1424_v25  ;;  %v1474_v28 = vld [vmem:[#allocation22] sm:$0x1] }
 0x55a   :  { %v1441_v12 = vmul.f32 %v1425_v42, %v1425_v42  ;;  %v1442_v18 = vmul.f32 %v1426_v46, %v1426_v46  ;;  %v1443_v53 = vmul.f32 %v1427_v50, %v1427_v50  ;;  %v1444_v40 = vmul.f32 %v1428_v3, %v1428_v3  ;;  %v1680_v3 = vld [vmem:[#allocation25] ss:$0 sm:$0xff] }
 0x55b   :  { %2546 = vmatpush3.bf16.msra.mxu1 %v2545_v39  ;;  %v1449_v15 = vadd.f32 %v1448_v29, %v1434_v63  ;;  %v1445_v22 = vmul.f32 %v1429_v61, %v1429_v61  ;;  %v1446_v14 = vmul.f32 %v1430_v31, %v1430_v31  ;;  %v1447_v24 = vmul.f32 %v1431_v11, %v1431_v11 }
 0x55c   :  { %2547 = vmatprep.subr.bf16.mxu1 %v2997_v21  ;;  %v2551_v7 = vpack.c.bf16 %v1577_v41, %v1576_v4 }
 0x55d   :  { %v1450_v10 = vadd.f32 %v1449_v15, %v1435_v6 }
 0x55f   :  { %2549 = vmatpush3.bf16.msra.mxu1 %v2548_v51  ;;  %v1451_v9 = vadd.f32 %v1450_v10, %v1436_v44 }
 0x560   :  { %2550 = vmatprep.subr.bf16.mxu1 %v2997_v21 }
 0x561   :  { %v1452_v56 = vadd.f32 %v1451_v9, %v1437_v54 }
 0x563   :  { %v1453_v0 = vadd.f32 %v1452_v56, %v1438_v30  ;;  %2552 = vmatpush3.bf16.msra.mxu1 %v2551_v7 }
 0x565   :  { %v1454_v38 = vadd.f32 %v1453_v0, %v1439_v59 }
 0x567   :  { %v1455_v2 = vadd.f32 %v1454_v38, %v1440_v34 }
 0x569   :  { %v1456_v43 = vadd.f32 %v1455_v2, %v1441_v12 }
 0x56b   :  { %v1457_v20 = vadd.f32 %v1456_v43, %v1442_v18 }
 0x56d   :  { %v1458_v23 = vadd.f32 %v1457_v20, %v1443_v53 }
 0x56f   :  { %v1459_v13 = vadd.f32 %v1458_v23, %v1444_v40 }
 0x571   :  { %v1460_v21 = vadd.f32 %v1459_v13, %v1445_v22 }
 0x573   :  { %v1461_v32 = vadd.f32 %v1460_v21, %v1446_v14 }
 0x575   :  { %v1462_v45 = vadd.f32 %v1461_v32, %v1447_v24 }
 0x577   :  { %v1463_v47 = vrot.slane %v1462_v45, 4 }
 0x579   :  { %v1464_v33 = vadd.f32 %v1463_v47, %v1462_v45 }
 0x57b   :  { %v1465_v52 = vrot.slane %v1464_v33, 2 }
 0x57d   :  { %v1466_v55 = vadd.f32 %v1465_v52, %v1464_v33 }
 0x57f   :  { %v1467_v57 = vrot.slane %v1466_v55, 1 }
 0x581   :  { %v1468_v35 = vadd.f32 %v1467_v57, %v1466_v55 }
 0x583   :  { %v1469_v60 = vmul.f32 0.0078125, %v1468_v35 }
 0x585   :  { %v1471_v36 = vadd.f32 1e-05, %v1469_v60 }
 0x587   :  { %2608 = vrsqrt.f32 %v1471_v36 }
 0x591   :  { %v2609_v37 = vpop.eup %2608 }
 0x592   :  { %v1473_v1 = vmul.f32 %v2609_v37, %v1470_v5 }
 0x594   :  { %v1475_v16 = vmul.f32 %v1473_v1, %v3663_v62  ;;  %v1552_v8 = vrot.slane %v1473_v1, %v3473_v17 }
 0x596   :  { %v1476_v26 = vsub.f32 %v1474_v28, %v1475_v16 }
 0x598   :  { %v1559_v42 = vrot.slane %v1476_v26, %v3473_v17 }
 0x619   :  { %v1544_v48 = vpop.f32.mrb[16].mxu1 }
 0x61a   :  { %v1554_v25 = vmul.f32 %v1552_v8, %v1544_v48  ;;  %v2277_v46 = vpop.f32.mrb[17].mxu1 }
 0x61c   :  { %v1561_v50 = vadd.f32 %v1559_v42, %v1554_v25 }
 0x61e   :  { %2311 = vmatmul.mubr.f32.vlgmr.msra.gmra.mrb[18].mxu1 %v1561_v50 }
 0x6f1   :  { %v1651_v61 = vpop.f32.mrb[18].mxu1 }
 0x6f2   :  { %v1652_v62 = vadd.f32 %v1680_v3, %v1651_v61  ;;  %v2312_v31 = vpop.f32.mrb[19].mxu1 }
 0x6f4   :  { %1655 = vst [vmem:[#allocation26] sm:$0xf] %v1652_v62 }
 0x6f5   :  { %2951 = shalt.err (!%p2948_p12)
}
 0x6f6   :  { %s2952_s30 = scalar_lea.hbm %s3729_s15, 64 }
 0x6f7   :  { %p2953_p13 = scmp.ne.s32.totalorder %s3729_s15, %s2952_s30  ;;  %p2956_p0 = scmp.lt.u32.totalorder %s2952_s30, %s3729_s15 }
 0x6f9   :  { %p2958_p1 = pnand %p2956_p0, %p2953_p13 }
 0x6fb   :  { %2961 = shalt.err (!%p2958_p1)
}
 0x6fc   :  { %1665 = dma.vmem_to_hbm [thread:$0]  %s1663_s4, 64, %s3729_s15, [#allocation4]  }
 0x6fd   :  { %2978 = dma.done.wait [#allocation4], 64  }
 0x6fe   :  { %2979 = vsyncadd [#allocation4], 4294967232 }
 0x6ff   :  { %1669 = vsyncpa [#allocation3], 1 }
 0x700   :  { %1670 = vsyncpa [#allocation6], 1 }
 0x701   :  { %1671 = vsyncpa [#allocation9], 1 }
 0x702   :  { %1672 = vsyncpa [#allocation12], 1 }
 0x703   :  { %1673 = vsyncpa [#allocation15], 1 }
 0x704   :  { %1674 = vsyncpa [#allocation18], 1 }
 0x705   :  { %1675 = vsyncpa [#allocation21], 1 }
 0x706   :  { %1676 = vsyncpa [#allocation24], 1 }
 0x707   :  { %1677 = vsyncpa [#allocation4], 1 }

</bundles_post_ra>
